<compile_context>
chip_gen: v7x
topology: tpu7x:2x2x1
jax: 0.10.0
libtpu: 0.0.40
codegen_flags: <defaults>
</compile_context>

<pallas_src>
import jax
import jax.numpy as jnp
from jax.experimental import pallas as pl
from jax.experimental.pallas import tpu as pltpu

# ----------------------------- model hyper-params -----------------------------
B = 32             # batch (small, but big enough to fill MXU rows / 2 grid steps)
L = 16             # sequence length
DIM = 32           # embedding dim
VOCAB = 50         # vocab size
KERNEL_NUM = 8     # out_channels per conv
KERNEL_SIZES = (3, 4, 5)
CLASS_NUM = 4

KMAX = max(KERNEL_SIZES)
T_OUT = L - min(KERNEL_SIZES) + 1            # real superset of time positions = 14
T_OUT_PAD = 16                               # sublane-aligned time positions
L_PAD = T_OUT_PAD + KMAX - 1                 # zero-padded sequence length = 20
N_FEAT = len(KERNEL_SIZES) * KERNEL_NUM      # real concat feature width = 24
N_FEAT_PAD = 128                             # lane-dense fused conv channel width
FC_OUT_PAD = 128                             # lane-dense classifier width (sliced in wrapper)

TB_TARGET = 16                               # tb*T_OUT_PAD = 256 MXU rows; grid = B//tb = 2 (even)
MATMUL_DTYPE = jnp.float32                   # set jnp.bfloat16 on v6e/v7x at scaled shapes
                                             # (keeps preferred_element_type=f32; breaks the
                                             # 1e-4 exact-parity check below if flipped).

# TODO(synk): args.dropout is identity in eval mode; training-mode dropout
# (pltpu.prng_random_bits mask + rescale) is not implemented here.


def _textcnn_kernel(emb_ref, wconv_ref, bconv_ref, mask_ref, fcw_ref, fcb_ref,
                    out_ref):
    # emb_ref:   (KMAX, tb, T_OUT_PAD, DIM)  time-shifted emb views (DMA-aligned)
    # wconv_ref: (KMAX, DIM, N_FEAT_PAD)     fused conv weights, per shift slab
    # bconv_ref: (1, N_FEAT_PAD)             fused conv bias
    # mask_ref:  (T_OUT_PAD, N_FEAT_PAD)     per-branch time-validity mask
    # fcw_ref:   (N_FEAT_PAD, FC_OUT_PAD)    classifier weight (lane-padded)
    # fcb_ref:   (1, FC_OUT_PAD)             classifier bias   (lane-padded)
    tb = emb_ref.shape[1]
    m = tb * T_OUT_PAD

    # --- fused conv = sum of KMAX time-shifted matmuls (no im2col concat) ------
    acc = jnp.zeros((m, N_FEAT_PAD), jnp.float32)
    for j in range(KMAX):                                  # static, unrolled (KMAX=5)
        x_j = emb_ref[j].reshape(m, DIM).astype(MATMUL_DTYPE)     # aligned reshape
        w_j = wconv_ref[j].astype(MATMUL_DTYPE)                   # (DIM, N_FEAT_PAD)
        acc = acc + jnp.dot(x_j, w_j, preferred_element_type=jnp.float32)

    # --- bias + ReLU (f32 VPU, v5e-safe) ---------------------------------------
    scores = jnp.maximum(acc + bconv_ref[...], 0.0)        # (m, N_FEAT_PAD)
    scores = scores.reshape(tb, T_OUT_PAD, N_FEAT_PAD)

    # --- masked max-over-time (invalid / padded positions zeroed; ReLU >= 0 so
    #     zeros never win the max -- switch to additive -inf mask if the
    #     activation ever changes) ----------------------------------------------
    scores = scores * mask_ref[...]
    pooled = jnp.max(scores, axis=1)                       # (tb, N_FEAT_PAD)

    # --- classifier: lane-dense (128, 128) matmul ------------------------------
    logits = jnp.dot(pooled.astype(MATMUL_DTYPE), fcw_ref[...].astype(MATMUL_DTYPE),
                     preferred_element_type=jnp.float32) + fcb_ref[...]
    out_ref[...] = logits.astype(out_ref.dtype)


def textcnn_forward(emb_shift, w_all, b_all, mask, fc_w_pad, fc_b_pad):
    """emb_shift: (KMAX, B, T_OUT_PAD, DIM); w_all: (KMAX, DIM, N_FEAT_PAD);
    b_all: (1, N_FEAT_PAD); mask: (T_OUT_PAD, N_FEAT_PAD);
    fc_w_pad: (N_FEAT_PAD, FC_OUT_PAD); fc_b_pad: (1, FC_OUT_PAD)."""
    # Keep tb as large as VMEM allows (fills MXU rows) while keeping >=2 grid
    # steps so the auto-pipeline overlaps emb DMA with compute and the
    # "parallel" axis shards across both v7x TensorCores.
    tb = TB_TARGET if (B % TB_TARGET == 0 and B > TB_TARGET) else B
    grid = (B // tb,)

    # TODO(synk): the constant weight/bias/mask blocks could be single-buffered
    # via pipeline_mode=pl.Buffered(1) to halve their VMEM footprint at scaled
    # shapes; left at the default here (negligible at these sizes).
    out = pl.pallas_call(
        _textcnn_kernel,
        out_shape=jax.ShapeDtypeStruct((B, FC_OUT_PAD), jnp.float32),
        grid_spec=pltpu.PrefetchScalarGridSpec(
            num_scalar_prefetch=0,
            grid=grid,
            in_specs=[
                pl.BlockSpec((KMAX, tb, T_OUT_PAD, DIM), lambda i: (0, i, 0, 0)),  # shifted emb tiles
                pl.BlockSpec((KMAX, DIM, N_FEAT_PAD), lambda i: (0, 0, 0)),        # fused conv weights
                pl.BlockSpec((1, N_FEAT_PAD), lambda i: (0, 0)),                   # fused conv bias
                pl.BlockSpec((T_OUT_PAD, N_FEAT_PAD), lambda i: (0, 0)),           # validity mask
                pl.BlockSpec((N_FEAT_PAD, FC_OUT_PAD), lambda i: (0, 0)),          # fc weight (lane-padded)
                pl.BlockSpec((1, FC_OUT_PAD), lambda i: (0, 0)),                   # fc bias (lane-padded)
            ],
            out_specs=pl.BlockSpec((tb, FC_OUT_PAD), lambda i: (i, 0)),            # lane-dense store
        ),
        compiler_params=pltpu.CompilerParams(
            dimension_semantics=("parallel",),
            vmem_limit_bytes=32 * 1024 * 1024),
    )(emb_shift, w_all, b_all, mask, fc_w_pad, fc_b_pad)
    return out[:, :CLASS_NUM]


def reference_forward(emb, conv_ws, conv_bs, fc_w_t, fc_b):
    """Pure-JAX reference mirroring the PyTorch forward (unfused, unpacked weights)."""
    feats = []
    for k, w, bvec in zip(KERNEL_SIZES, conv_ws, conv_bs):
        w_mat = w.reshape(KERNEL_NUM, k * DIM).T          # (k*D, C)
        t_out = L - k + 1
        scores = []
        for t in range(t_out):
            win = emb[:, t:t + k, :].reshape(B, k * DIM)
            scores.append(jnp.maximum(win @ w_mat + bvec[None, :], 0.0))
        feats.append(jnp.max(jnp.stack(scores, axis=0), axis=0))
    feat = jnp.concatenate(feats, axis=1)                 # (B, N_FEAT)
    return feat @ fc_w_t.T + fc_b[None, :]


if __name__ == "__main__":
    key = jax.random.PRNGKey(0)
    keys = jax.random.split(key, 4 + 2 * len(KERNEL_SIZES))

    # token ids (B, L)
    tokens = jax.random.randint(keys[0], (B, L), 0, VOCAB, dtype=jnp.int32)

    # embedding table (vocab, dim) ~ N(0, 1) like nn.Embedding default
    embed_table = jax.random.normal(keys[1], (VOCAB, DIM), dtype=jnp.float32)

    # conv weights in torch layout (C_out, 1, k, D) and biases (C_out,)
    conv_ws, conv_bs = [], []
    for i, k in enumerate(KERNEL_SIZES):
        conv_ws.append(0.1 * jax.random.normal(keys[2 + 2 * i],
                                               (KERNEL_NUM, 1, k, DIM), jnp.float32))
        conv_bs.append(0.1 * jax.random.normal(keys[3 + 2 * i],
                                               (KERNEL_NUM,), jnp.float32))

    # fc: torch Linear(len(K)*C, class_num): weight (class_num, len(K)*C)
    fc_w_t = 0.1 * jax.random.normal(keys[-2], (CLASS_NUM, N_FEAT), jnp.float32)
    fc_b = 0.1 * jax.random.normal(keys[-1], (CLASS_NUM,), jnp.float32)

    # --- embedding lookup (gather) as plain-JAX glue ---------------------------
    emb = embed_table[tokens]                             # (B, L, D)
    # TODO(synk): for real vocab/seq sizes keep the table HBM-resident
    # (memory_space=pl.ANY) and gather inside the kernel via scalar-prefetched
    # token ids; at VOCAB=50 the wrapper-side gather is fine.

    # --- stage the KMAX time-shifted emb views (layout plumbing, DMA-aligned) --
    emb_pad = jnp.pad(emb, ((0, 0), (0, L_PAD - L), (0, 0)))            # (B, L_PAD, D)
    emb_shift = jnp.stack([emb_pad[:, j:j + T_OUT_PAD, :] for j in range(KMAX)],
                          axis=0)                                       # (KMAX, B, 16, D)

    # --- pack parameters for the fused kernel ----------------------------------
    w_cols, b_cols, mask_cols = [], [], []
    for k, w, bvec in zip(KERNEL_SIZES, conv_ws, conv_bs):
        w_mat = w.reshape(KERNEL_NUM, k * DIM).T          # (k*D, C), matches window flatten order
        w_cols.append(jnp.pad(w_mat, ((0, (KMAX - k) * DIM), (0, 0))))  # zero-pad unused shifts
        b_cols.append(bvec.reshape(1, KERNEL_NUM))
        valid = (jnp.arange(T_OUT_PAD) < (L - k + 1)).astype(jnp.float32)
        mask_cols.append(jnp.tile(valid[:, None], (1, KERNEL_NUM)))

    w_all = jnp.concatenate(w_cols, axis=1)                              # (KMAX*D, 24)
    w_all = jnp.pad(w_all, ((0, 0), (0, N_FEAT_PAD - N_FEAT)))           # (KMAX*D, 128)
    w_all = w_all.reshape(KMAX, DIM, N_FEAT_PAD)                         # (KMAX, D, 128)

    b_all = jnp.concatenate(b_cols, axis=1)                              # (1, 24)
    b_all = jnp.pad(b_all, ((0, 0), (0, N_FEAT_PAD - N_FEAT)))           # (1, 128)

    mask = jnp.concatenate(mask_cols, axis=1)                            # (16, 24)
    mask = jnp.pad(mask, ((0, 0), (0, N_FEAT_PAD - N_FEAT)))             # (16, 128)

    fc_w_pad = jnp.zeros((N_FEAT_PAD, FC_OUT_PAD), jnp.float32)
    fc_w_pad = fc_w_pad.at[:N_FEAT, :CLASS_NUM].set(fc_w_t.T)            # (128, 128)
    fc_b_pad = jnp.zeros((1, FC_OUT_PAD), jnp.float32)
    fc_b_pad = fc_b_pad.at[0, :CLASS_NUM].set(fc_b)                      # (1, 128)

    out = textcnn_forward(emb_shift, w_all, b_all, mask, fc_w_pad, fc_b_pad)
    out = jax.block_until_ready(out)

    ref = reference_forward(emb, conv_ws, conv_bs, fc_w_t, fc_b)
    assert out.shape == (B, CLASS_NUM)
    assert jnp.allclose(out, ref, atol=1e-4, rtol=1e-4), "mismatch vs reference"

    print("KERNEL_OK")
</pallas_src>

<mosaic_0001>
module attributes {stable_mosaic.version = 11 : i64} {
  func.func @_textcnn_kernel(%arg0: i32, %arg1: memref<5x16x16x32xf32, #tpu.memory_space<vmem>>, %arg2: memref<5x32x128xf32, #tpu.memory_space<vmem>>, %arg3: memref<1x128xf32, #tpu.memory_space<vmem>>, %arg4: memref<16x128xf32, #tpu.memory_space<vmem>>, %arg5: memref<128x128xf32, #tpu.memory_space<vmem>>, %arg6: memref<1x128xf32, #tpu.memory_space<vmem>>, %arg7: memref<16x128xf32, #tpu.memory_space<vmem>>) attributes {dimension_semantics = [#tpu.dimension_semantics<parallel>], iteration_bounds = array<i64: 2>, scalar_prefetch = 0 : i64, scratch_operands = 0 : i64, tpu.core_type = #tpu.core_type<tc>, window_params = [{transform_indices = @transform_0, window_bounds = array<i64: 5, 16, 16, 32>}, {pipeline_mode = #tpu.pipeline_mode<synchronous>, transform_indices = @transform_1, window_bounds = array<i64: 5, 32, 128>}, {pipeline_mode = #tpu.pipeline_mode<synchronous>, transform_indices = @transform_2, window_bounds = array<i64: 1, 128>}, {pipeline_mode = #tpu.pipeline_mode<synchronous>, transform_indices = @transform_3, window_bounds = array<i64: 16, 128>}, {pipeline_mode = #tpu.pipeline_mode<synchronous>, transform_indices = @transform_4, window_bounds = array<i64: 128, 128>}, {pipeline_mode = #tpu.pipeline_mode<synchronous>, transform_indices = @transform_5, window_bounds = array<i64: 1, 128>}, {transform_indices = @transform_6, window_bounds = array<i64: 16, 128>}]} {
    %cst = arith.constant 0.000000e+00 : f32
    %0 = vector.broadcast %cst : f32 to vector<256x128xf32>
    %c0 = arith.constant 0 : index
    %c0_0 = arith.constant 0 : index
    %c0_1 = arith.constant 0 : index
    %c0_2 = arith.constant 0 : index
    %1 = vector.load %arg1[%c0, %c0_0, %c0_1, %c0_2] : memref<5x16x16x32xf32, #tpu.memory_space<vmem>>, vector<1x16x16x32xf32>
    %2 = vector.shape_cast %1 : vector<1x16x16x32xf32> to vector<16x16x32xf32>
    %3 = vector.shape_cast %2 : vector<16x16x32xf32> to vector<256x32xf32>
    %c0_3 = arith.constant 0 : index
    %c0_4 = arith.constant 0 : index
    %c0_5 = arith.constant 0 : index
    %4 = vector.load %arg2[%c0_3, %c0_4, %c0_5] : memref<5x32x128xf32, #tpu.memory_space<vmem>>, vector<1x32x128xf32>
    %5 = vector.shape_cast %4 : vector<1x32x128xf32> to vector<32x128xf32>
    %cst_6 = arith.constant dense<0.000000e+00> : vector<256x128xf32>
    %6 = tpu.matmul %3, %5, %cst_6 {dimension_numbers = #tpu.dot_dimension_numbers<[1], [0], [0], [1], [0, 0, 1, 1], [], []>} : vector<256x32xf32>, vector<32x128xf32>, vector<256x128xf32> -> vector<256x128xf32>
    %7 = arith.addf %0, %6 : vector<256x128xf32>
    %c1 = arith.constant 1 : index
    %c0_7 = arith.constant 0 : index
    %c0_8 = arith.constant 0 : index
    %c0_9 = arith.constant 0 : index
    %8 = vector.load %arg1[%c1, %c0_7, %c0_8, %c0_9] : memref<5x16x16x32xf32, #tpu.memory_space<vmem>>, vector<1x16x16x32xf32>
    %9 = vector.shape_cast %8 : vector<1x16x16x32xf32> to vector<16x16x32xf32>
    %10 = vector.shape_cast %9 : vector<16x16x32xf32> to vector<256x32xf32>
    %c1_10 = arith.constant 1 : index
    %c0_11 = arith.constant 0 : index
    %c0_12 = arith.constant 0 : index
    %11 = vector.load %arg2[%c1_10, %c0_11, %c0_12] : memref<5x32x128xf32, #tpu.memory_space<vmem>>, vector<1x32x128xf32>
    %12 = vector.shape_cast %11 : vector<1x32x128xf32> to vector<32x128xf32>
    %cst_13 = arith.constant dense<0.000000e+00> : vector<256x128xf32>
    %13 = tpu.matmul %10, %12, %cst_13 {dimension_numbers = #tpu.dot_dimension_numbers<[1], [0], [0], [1], [0, 0, 1, 1], [], []>} : vector<256x32xf32>, vector<32x128xf32>, vector<256x128xf32> -> vector<256x128xf32>
    %14 = arith.addf %7, %13 : vector<256x128xf32>
    %c2 = arith.constant 2 : index
    %c0_14 = arith.constant 0 : index
    %c0_15 = arith.constant 0 : index
    %c0_16 = arith.constant 0 : index
    %15 = vector.load %arg1[%c2, %c0_14, %c0_15, %c0_16] : memref<5x16x16x32xf32, #tpu.memory_space<vmem>>, vector<1x16x16x32xf32>
    %16 = vector.shape_cast %15 : vector<1x16x16x32xf32> to vector<16x16x32xf32>
    %17 = vector.shape_cast %16 : vector<16x16x32xf32> to vector<256x32xf32>
    %c2_17 = arith.constant 2 : index
    %c0_18 = arith.constant 0 : index
    %c0_19 = arith.constant 0 : index
    %18 = vector.load %arg2[%c2_17, %c0_18, %c0_19] : memref<5x32x128xf32, #tpu.memory_space<vmem>>, vector<1x32x128xf32>
    %19 = vector.shape_cast %18 : vector<1x32x128xf32> to vector<32x128xf32>
    %cst_20 = arith.constant dense<0.000000e+00> : vector<256x128xf32>
    %20 = tpu.matmul %17, %19, %cst_20 {dimension_numbers = #tpu.dot_dimension_numbers<[1], [0], [0], [1], [0, 0, 1, 1], [], []>} : vector<256x32xf32>, vector<32x128xf32>, vector<256x128xf32> -> vector<256x128xf32>
    %21 = arith.addf %14, %20 : vector<256x128xf32>
    %c3 = arith.constant 3 : index
    %c0_21 = arith.constant 0 : index
    %c0_22 = arith.constant 0 : index
    %c0_23 = arith.constant 0 : index
    %22 = vector.load %arg1[%c3, %c0_21, %c0_22, %c0_23] : memref<5x16x16x32xf32, #tpu.memory_space<vmem>>, vector<1x16x16x32xf32>
    %23 = vector.shape_cast %22 : vector<1x16x16x32xf32> to vector<16x16x32xf32>
    %24 = vector.shape_cast %23 : vector<16x16x32xf32> to vector<256x32xf32>
    %c3_24 = arith.constant 3 : index
    %c0_25 = arith.constant 0 : index
    %c0_26 = arith.constant 0 : index
    %25 = vector.load %arg2[%c3_24, %c0_25, %c0_26] : memref<5x32x128xf32, #tpu.memory_space<vmem>>, vector<1x32x128xf32>
    %26 = vector.shape_cast %25 : vector<1x32x128xf32> to vector<32x128xf32>
    %cst_27 = arith.constant dense<0.000000e+00> : vector<256x128xf32>
    %27 = tpu.matmul %24, %26, %cst_27 {dimension_numbers = #tpu.dot_dimension_numbers<[1], [0], [0], [1], [0, 0, 1, 1], [], []>} : vector<256x32xf32>, vector<32x128xf32>, vector<256x128xf32> -> vector<256x128xf32>
    %28 = arith.addf %21, %27 : vector<256x128xf32>
    %c4 = arith.constant 4 : index
    %c0_28 = arith.constant 0 : index
    %c0_29 = arith.constant 0 : index
    %c0_30 = arith.constant 0 : index
    %29 = vector.load %arg1[%c4, %c0_28, %c0_29, %c0_30] : memref<5x16x16x32xf32, #tpu.memory_space<vmem>>, vector<1x16x16x32xf32>
    %30 = vector.shape_cast %29 : vector<1x16x16x32xf32> to vector<16x16x32xf32>
    %31 = vector.shape_cast %30 : vector<16x16x32xf32> to vector<256x32xf32>
    %c4_31 = arith.constant 4 : index
    %c0_32 = arith.constant 0 : index
    %c0_33 = arith.constant 0 : index
    %32 = vector.load %arg2[%c4_31, %c0_32, %c0_33] : memref<5x32x128xf32, #tpu.memory_space<vmem>>, vector<1x32x128xf32>
    %33 = vector.shape_cast %32 : vector<1x32x128xf32> to vector<32x128xf32>
    %cst_34 = arith.constant dense<0.000000e+00> : vector<256x128xf32>
    %34 = tpu.matmul %31, %33, %cst_34 {dimension_numbers = #tpu.dot_dimension_numbers<[1], [0], [0], [1], [0, 0, 1, 1], [], []>} : vector<256x32xf32>, vector<32x128xf32>, vector<256x128xf32> -> vector<256x128xf32>
    %35 = arith.addf %28, %34 : vector<256x128xf32>
    %c0_35 = arith.constant 0 : index
    %c0_36 = arith.constant 0 : index
    %36 = vector.load %arg3[%c0_35, %c0_36] : memref<1x128xf32, #tpu.memory_space<vmem>>, vector<1x128xf32>
    %37 = vector.broadcast %36 : vector<1x128xf32> to vector<256x128xf32>
    %38 = arith.addf %35, %37 : vector<256x128xf32>
    %cst_37 = arith.constant 0.000000e+00 : f32
    %39 = vector.broadcast %cst_37 : f32 to vector<256x128xf32>
    %40 = arith.maximumf %38, %39 : vector<256x128xf32>
    %41 = vector.shape_cast %40 : vector<256x128xf32> to vector<16x16x128xf32>
    %c0_38 = arith.constant 0 : index
    %c0_39 = arith.constant 0 : index
    %42 = vector.load %arg4[%c0_38, %c0_39] : memref<16x128xf32, #tpu.memory_space<vmem>>, vector<16x128xf32>
    %43 = vector.shape_cast %42 : vector<16x128xf32> to vector<1x16x128xf32>
    %44 = vector.broadcast %43 : vector<1x16x128xf32> to vector<16x16x128xf32>
    %45 = arith.mulf %41, %44 : vector<16x16x128xf32>
    %cst_40 = arith.constant dense<0xFF800000> : vector<16x128xf32>
    %46 = vector.multi_reduction <maximumf>, %45, %cst_40 [1] : vector<16x16x128xf32> to vector<16x128xf32>
    %c0_41 = arith.constant 0 : index
    %c0_42 = arith.constant 0 : index
    %47 = vector.load %arg5[%c0_41, %c0_42] : memref<128x128xf32, #tpu.memory_space<vmem>>, vector<128x128xf32>
    %cst_43 = arith.constant dense<0.000000e+00> : vector<16x128xf32>
    %48 = tpu.matmul %46, %47, %cst_43 {dimension_numbers = #tpu.dot_dimension_numbers<[1], [0], [0], [1], [0, 0, 1, 1], [], []>} : vector<16x128xf32>, vector<128x128xf32>, vector<16x128xf32> -> vector<16x128xf32>
    %c0_44 = arith.constant 0 : index
    %c0_45 = arith.constant 0 : index
    %49 = vector.load %arg6[%c0_44, %c0_45] : memref<1x128xf32, #tpu.memory_space<vmem>>, vector<1x128xf32>
    %50 = vector.broadcast %49 : vector<1x128xf32> to vector<16x128xf32>
    %51 = arith.addf %48, %50 : vector<16x128xf32>
    %c0_46 = arith.constant 0 : index
    %c0_47 = arith.constant 0 : index
    %52 = vector.load %arg7[%c0_46, %c0_47] : memref<16x128xf32, #tpu.memory_space<vmem>>, vector<16x128xf32>
    tpu.vector_store %arg7[%c0_46, %c0_47], %51 {strides = array<i32>} : memref<16x128xf32, #tpu.memory_space<vmem>>, vector<16x128xf32>,
    return
  }
  func.func @transform_0(%arg0: i32) -> (i32, i32, i32, i32) {
    %c0_i32 = arith.constant 0 : i32
    %c0_i32_0 = arith.constant 0 : i32
    %c0_i32_1 = arith.constant 0 : i32
    %c0_i32_2 = arith.constant 0 : i32
    return %c0_i32, %arg0, %c0_i32_0, %c0_i32_1 : i32, i32, i32, i32
  }
  func.func @transform_1(%arg0: i32) -> (i32, i32, i32) {
    %c0_i32 = arith.constant 0 : i32
    %c0_i32_0 = arith.constant 0 : i32
    %c0_i32_1 = arith.constant 0 : i32
    %c0_i32_2 = arith.constant 0 : i32
    return %c0_i32, %c0_i32_0, %c0_i32_1 : i32, i32, i32
  }
  func.func @transform_2(%arg0: i32) -> (i32, i32) {
    %c0_i32 = arith.constant 0 : i32
    %c0_i32_0 = arith.constant 0 : i32
    %c0_i32_1 = arith.constant 0 : i32
    return %c0_i32, %c0_i32_0 : i32, i32
  }
  func.func @transform_3(%arg0: i32) -> (i32, i32) {
    %c0_i32 = arith.constant 0 : i32
    %c0_i32_0 = arith.constant 0 : i32
    %c0_i32_1 = arith.constant 0 : i32
    return %c0_i32, %c0_i32_0 : i32, i32
  }
  func.func @transform_4(%arg0: i32) -> (i32, i32) {
    %c0_i32 = arith.constant 0 : i32
    %c0_i32_0 = arith.constant 0 : i32
    %c0_i32_1 = arith.constant 0 : i32
    return %c0_i32, %c0_i32_0 : i32, i32
  }
  func.func @transform_5(%arg0: i32) -> (i32, i32) {
    %c0_i32 = arith.constant 0 : i32
    %c0_i32_0 = arith.constant 0 : i32
    %c0_i32_1 = arith.constant 0 : i32
    return %c0_i32, %c0_i32_0 : i32, i32
  }
  func.func @transform_6(%arg0: i32) -> (i32, i32) {
    %c0_i32 = arith.constant 0 : i32
    %c0_i32_0 = arith.constant 0 : i32
    return %arg0, %c0_i32 : i32, i32
  }
}

</mosaic_0001>

<bundles_post_ra>
// kernel: tpu_custom_call.1
= control target key start
LH: loop header
LB: loop body
LE: loop exit
PB: predicated region body
PF: predicated region fallthrough
CT: control target
= control target key end

     0   :  { %s4908_s0 = inlined_call_operand.hbm [shape: f32[5,32,16,32], index: 0, kind: input, shape index: {}]   ;;  %s4909_s1 = inlined_call_operand.hbm [shape: f32[5,32,128], index: 1, kind: input, shape index: {}]   ;;  %s4910_s2 = inlined_call_operand.hbm [shape: f32[1,128], index: 2, kind: input, shape index: {}]   ;;  %s4911_s3 = inlined_call_operand.hbm [shape: f32[16,128], index: 3, kind: input, shape index: {}]   ;;  %s4912_s4 = inlined_call_operand.hbm [shape: f32[128,128], index: 4, kind: input, shape index: {}]   ;;  %s4913_s5 = inlined_call_operand.hbm [shape: f32[1,128], index: 5, kind: input, shape index: {}]   ;;  %s4914_s6 = inlined_call_operand.hbm [shape: f32[32,128], index: 6, kind: output, shape index: {}]  }
   0x1   :  { %4924 = sst [smem:[#allocation26_spill]] %s4909_s1 }
   0x2   :  { %11 = vsyncpa [#allocation3], 0 }
   0x3   :  { %13 = vsyncpa [#allocation3 + $0x1], 0 }
   0x4   :  { %14 = vsyncpa [#allocation6], 0 }
   0x5   :  { %15 = vsyncpa [#allocation9], 0 }
   0x6   :  { %16 = vsyncpa [#allocation12], 0 }
   0x7   :  { %17 = vsyncpa [#allocation4], 0 }
   0x8   :  { %19 = vsyncpa [#allocation4 + $0x1], 0  ;;  %s4169_s21 = smov 0   ;;  %s4171_s22 = smov 0  }
   0x9   :  { %s4173_s23 = smov 0   ;;  %s4175_s24 = smov 0  }
   0xa LB: > { %4925 = sst [smem:[#allocation22_spill]] %s4104_s21  ;;  %s4190_s25 = sadd.s32 4294967295, %s4116_s24   ;;  %s4116_s24 = sphi %s4175_s24, %s4950_s24   ;;  %s4112_s23 = sphi %s4173_s23, %s4954_s23   ;;  %s4108_s22 = sphi %s4171_s22, %s4953_s22   ;;  %s4104_s21 = sphi %s4169_s21, %s4952_s21  }
   0xb   : > { %s2748_s26 = sadd.s32 4294967294, %s4116_s24   ;;  %s4194_s27 = sadd.s32 1, %s4116_s24  }
   0xc   : > { %4926 = sst [smem:[#allocation23_spill]] %s4194_s27  ;;  %s32_s28 = sadd.s32 1, %s4112_s23 }
   0xd   : > { %s29_s29 = ssub.s32 %s4116_s24, %s4194_s27  ;;  %p39_p0 = scmp.ne.s32.totalorder %s4112_s23, %s4108_s22 }
   0xe   : > { %p30_p1 = scmp.eq.s32.totalorder %s29_s29, 0  ;;  %p40_p2 = scmp.eq.s32.totalorder %s4116_s24, 0 }
   0xf   : > { %p45_p3 = scmp.ne.s32.totalorder %s4108_s22, %s4104_s21  ;;  %p4915_p4 = scmp.eq.s32.totalorder %s4190_s25, 0 }
  0x10   : > { %s4206_s30 = scalar_select %p30_p1, %s4112_s23, %s32_s28  }
  0x11   : > { %p4208_p5 = por %p40_p2, %p39_p0  ;;  %p4214_p6 = por %p4915_p4, %p45_p3 }
  0x12   : > { %4927 = sst [smem:[#allocation24_spill]] %s4206_s30  ;;  %p174_p7 = scmp.eq.s32.totalorder %s4190_s25, 1 }
  0x13   : > { %s4928_s7 = scalar_select %p4208_p5, 1, 0 }
  0x14   : > { %s4929_s8 = scalar_select %p4214_p6, 1, 0 }
  0x15   : > { %p180_p8 = scmp.eq.s32.totalorder %s2748_s26, 1  ;;  %p2749_p9 = scmp.ge.s32.totalorder %s4116_s24, 1 }
  0x16   : > { %p187_p10 = scmp.lt.s32.totalorder %s4116_s24, 3  ;;  %p4221_p11 = por %p174_p7, %p39_p0 }
  0x17   : > { %p4225_p12 = por %p180_p8, %p45_p3  ;;  %s4118_s12 = smov [#allocation5]  }
  0x18   : > { %s4930_s9 = scalar_select %p4221_p11, 1, 0 }
  0x19   : > { %s4931_s10 = scalar_select %p4225_p12, 1, 0 }
  0x1a   : > { %p4229_p13 = pnand %p2749_p9, %p187_p10  ;;  %s199_s13 = sshll.u32 %s4118_s12, 4  ;;  %s200_s13 = int_to_ptr.vmem [resolvable:$true] %s199_s13 }
  0x1b   : > { %4932 = sst [smem:[#allocation25_spill]] %s4931_s10  ;;  %s4119_s15 = smov [#allocation8]  }
  0x1c   : > { %s4933_s11 = scalar_select %p4229_p13, 1, 0 }
  0x1d   : > { %p3820_p1 = pneg %p4229_p13  ;;  %s223_s16 = sshll.u32 %s4119_s15, 4  ;;  %s4241_s16 = int_to_ptr.vmem [resolvable:$true] %s223_s16 }
  0x1e   : > { %s4935_s1 = sld [smem:[#allocation26_spill]] }
  0x1f   : > { %p4237_p2 = pnand %p3820_p1, %p4915_p4 }
  0x21   : > { %p4251_p3 = pneg %p4237_p2 }
  0x24   : > { %s3898_s19 = scalar_lea.hbm %s4935_s1, 2560 }
  0x25   : > { %p3899_p0 = scmp.ne.s32.totalorder %s4935_s1, %s3898_s19  ;;  %p3905_p9 = scmp.lt.u32.totalorder %s3898_s19, %s4935_s1 }
  0x27   : > { %p3901_p7 = pnand %p4251_p3, %p3899_p0 }
  0x29   : > { %p3902_p8 = pneg %p3901_p7 }
  0x2b   : > { %p3907_p10 = pnand %p3905_p9, %p3902_p8 }
  0x2d   : > { %3910 = shalt.err (!%p3907_p10)
}
  0x2e   : > { %s3911_s15 = scalar_lea.vmem %s200_s13, 2560  ;;  %p3919_p11 = scmp.lt.s32.totalorder %s200_s13, %s200_s13 }
  0x2f   : > { %p3912_p1 = scmp.ne.s32.totalorder %s200_s13, %s3911_s15  ;;  %p3920_p6 = scmp.lt.s32.totalorder %s3911_s15, %s3911_s15 }
  0x31   : > { %p3914_p4 = pnand %p3912_p1, %p4251_p3  ;;  %p3921_p13 = por %p3920_p6, %p3919_p11 }
  0x33   : > { %p3915_p12 = pneg %p3914_p4 }
  0x35   : > { %p3922_p5 = pnand %p3921_p13, %p3915_p12 }
  0x37   : > { %3925 = shalt.err (!%p3922_p5)
}
  0x38   : > { %s4120_s17 = smov 128   ;;  %s4121_s18 = smov 8  }
  0x39   : > { %3823 = dma.hbm_to_vmem [thread:$0]  (!%p4237_p2), %s4935_s1, 2560, %s200_s13, [#allocation6], %s4120_s17, %s4120_s17, %s4121_s18  }
  0x3a   : > { %s3926_s12 = scalar_lea.hbm %s4911_s3, 256 }
  0x3b   : > { %p3927_p4 = scmp.ne.s32.totalorder %s4911_s3, %s3926_s12  ;;  %p3933_p11 = scmp.lt.u32.totalorder %s3926_s12, %s4911_s3 }
  0x3d   : > { %p3929_p5 = pnand %p3927_p4, %p4251_p3 }
  0x3f   : > { %p3930_p6 = pneg %p3929_p5 }
  0x41   : > { %p3935_p12 = pnand %p3933_p11, %p3930_p6 }
  0x43   : > { %3938 = shalt.err (!%p3935_p12)
}
  0x44   : > { %s3939_s13 = scalar_lea.vmem %s4241_s16, 256  ;;  %p3947_p8 = scmp.lt.s32.totalorder %s4241_s16, %s4241_s16 }
  0x45   : > { %p3940_p13 = scmp.ne.s32.totalorder %s4241_s16, %s3939_s13  ;;  %p3948_p9 = scmp.lt.s32.totalorder %s3939_s13, %s3939_s13 }
  0x47   : > { %p3942_p0 = pnand %p3940_p13, %p4251_p3  ;;  %p3949_p10 = por %p3948_p9, %p3947_p8 }
  0x49   : > { %p3943_p7 = pneg %p3942_p0 }
  0x4b   : > { %p3950_p1 = pnand %p3949_p10, %p3943_p7 }
  0x4d   : > { %3953 = shalt.err (!%p3950_p1)
}
  0x4e   : > { %3829 = dma.hbm_to_vmem [thread:$0]  (!%p4237_p2), %s4911_s3, 256, %s4241_s16, [#allocation9], %s4120_s17, %s4120_s17, %s4121_s18  }
  0x4f   : > { %s4122_s10 = smov [#allocation7]   ;;  %s4123_s20 = smov [#allocation10]  }
  0x50   : > { %s213_s19 = sshll.u32 %s4122_s10, 4  ;;  %s236_s26 = sshll.u32 %s4123_s20, 4  ;;  %s214_s19 = int_to_ptr.vmem [resolvable:$true] %s213_s19  ;;  %s237_s26 = int_to_ptr.vmem [resolvable:$true] %s236_s26 }
  0x51   : > { %s3954_s15 = scalar_lea.hbm %s4910_s2, 16 }
  0x52   : > { %p3955_p4 = scmp.ne.s32.totalorder %s4910_s2, %s3954_s15  ;;  %p3961_p11 = scmp.lt.u32.totalorder %s3954_s15, %s4910_s2 }
  0x54   : > { %p3957_p5 = pnand %p3955_p4, %p4251_p3 }
  0x56   : > { %p3958_p6 = pneg %p3957_p5 }
  0x58   : > { %p3963_p12 = pnand %p3961_p11, %p3958_p6 }
  0x5a   : > { %3966 = shalt.err (!%p3963_p12)
}
  0x5b   : > { %s3967_s16 = scalar_lea.vmem %s214_s19, 16  ;;  %s3974_s30 = scalar_lea.vmem %s214_s19, 32 }
  0x5c   : > { %p3968_p13 = scmp.ne.s32.totalorder %s214_s19, %s3967_s16  ;;  %p3975_p8 = scmp.lt.s32.totalorder %s214_s19, %s214_s19 }
  0x5d   : > { %p3976_p9 = scmp.lt.s32.totalorder %s3974_s30, %s3967_s16 }
  0x5e   : > { %p3970_p0 = pnand %p3968_p13, %p4251_p3 }
  0x5f   : > { %p3977_p10 = por %p3976_p9, %p3975_p8 }
  0x60   : > { %p3971_p7 = pneg %p3970_p0 }
  0x62   : > { %p3978_p1 = pnand %p3977_p10, %p3971_p7 }
  0x64   : > { %3981 = shalt.err (!%p3978_p1)
}
  0x65   : > { %3826 = dma.hbm_to_vmem [thread:$0]  (!%p4237_p2), %s4910_s2, 16, %s214_s19, [#allocation6]  }
  0x66   : > { %s3982_s29 = scalar_lea.hbm %s4912_s4, 2048 }
  0x67   : > { %p3983_p4 = scmp.ne.s32.totalorder %s4912_s4, %s3982_s29  ;;  %p3989_p11 = scmp.lt.u32.totalorder %s3982_s29, %s4912_s4 }
  0x69   : > { %p3985_p5 = pnand %p3983_p4, %p4251_p3 }
  0x6b   : > { %p3986_p6 = pneg %p3985_p5 }
  0x6d   : > { %p3991_p12 = pnand %p3989_p11, %p3986_p6 }
  0x6f   : > { %3994 = shalt.err (!%p3991_p12)
}
  0x70   : > { %s3995_s16 = scalar_lea.vmem %s237_s26, 2048  ;;  %p4003_p8 = scmp.lt.s32.totalorder %s237_s26, %s237_s26 }
  0x71   : > { %p3996_p13 = scmp.ne.s32.totalorder %s237_s26, %s3995_s16  ;;  %p4004_p9 = scmp.lt.s32.totalorder %s3995_s16, %s3995_s16 }
  0x73   : > { %p3998_p0 = pnand %p3996_p13, %p4251_p3  ;;  %p4005_p10 = por %p4004_p9, %p4003_p8 }
  0x75   : > { %p3999_p7 = pneg %p3998_p0 }
  0x77   : > { %p4006_p1 = pnand %p4005_p10, %p3999_p7 }
  0x79   : > { %4009 = shalt.err (!%p4006_p1)
}
  0x7a   : > { %3832 = dma.hbm_to_vmem [thread:$0]  (!%p4237_p2), %s4912_s4, 2048, %s237_s26, [#allocation9], %s4120_s17, %s4120_s17, %s4121_s18  }
  0x7b   : > { %s4124_s1 = smov [#allocation11]   ;;  %s4010_s29 = scalar_lea.hbm %s4913_s5, 16 }
  0x7c   : > { %s250_s10 = sshll.u32 %s4124_s1, 4  ;;  %p4011_p4 = scmp.ne.s32.totalorder %s4913_s5, %s4010_s29  ;;  %s251_s10 = int_to_ptr.vmem [resolvable:$true] %s250_s10 }
  0x7d   : > { %p4017_p11 = scmp.lt.u32.totalorder %s4010_s29, %s4913_s5 }
  0x7e   : > { %p4013_p5 = pnand %p4011_p4, %p4251_p3 }
  0x80   : > { %p4014_p6 = pneg %p4013_p5 }
  0x82   : > { %p4019_p12 = pnand %p4017_p11, %p4014_p6 }
  0x84   : > { %4022 = shalt.err (!%p4019_p12)
}
  0x85   : > { %s4023_s17 = scalar_lea.vmem %s251_s10, 16  ;;  %s4030_s18 = scalar_lea.vmem %s251_s10, 32 }
  0x86   : > { %p4024_p13 = scmp.ne.s32.totalorder %s251_s10, %s4023_s17  ;;  %p4031_p8 = scmp.lt.s32.totalorder %s251_s10, %s251_s10 }
  0x87   : > { %p4032_p9 = scmp.lt.s32.totalorder %s4030_s18, %s4023_s17 }
  0x88   : > { %p4026_p0 = pnand %p4024_p13, %p4251_p3 }
  0x89   : > { %p4033_p10 = por %p4032_p9, %p4031_p8 }
  0x8a   : > { %p4027_p7 = pneg %p4026_p0 }
  0x8c   : > { %p4034_p1 = pnand %p4033_p10, %p4027_p7 }
  0x8e   : > { %4037 = shalt.err (!%p4034_p1)
}
  0x8f   : > { %3835 = dma.hbm_to_vmem [thread:$0]  (!%p4237_p2), %s4913_s5, 16, %s251_s10, [#allocation12]  }
  0x90   : > { %p2755_p4 = scmp.ge.s32.totalorder %s4116_s24, 2 }
  0x92   : > { %257 = sbr.rel (%p2755_p4) target bundleno = 169 (0xa9), region = 36 }
  0x99   : > { %s261_s28 = sand.u32 1, %s4112_s23   ;;  %s3064_s14 = sshll.u32 %s4116_s24, 12 }
  0x9a   : > { %s3787_s19 = smul.u32 1280, %s261_s28  ;;  %s4125_s30 = smov 8192  }
  0x9b   : > { %p4937_p3 = scmp.ne.s32.totalorder %s4928_s7, 0  ;;  %s272_s20 = scalar_lea.hbm %s4908_s0, %s3064_s14 }
  0x9c   : > { %s265_s12 = scalar_lea.vmem [#allocation2], %s3787_s19  ;;  %s4126_s13 = smov 4096  }
  0x9d   : > { %3800 = sst [smem:[#allocation15]] (%p4937_p3), %s4125_s30  ;;  %s285_s15 = sshll.u32 %s265_s12, 4  ;;  %s286_s15 = int_to_ptr.vmem [resolvable:$true] %s285_s15 }
  0x9e   : > { %s3799_s1 = scalar_select %p4937_p3, [#allocation0], [#allocation16] }
  0x9f   : > { %3801 = sst [smem:[#allocation15 + $0x1]] (%p4937_p3), %s4126_s13  ;;  %s4127_s27 = smov 32  }
  0xa0   : > { %s277_s29 = sld [smem:[%s3799_s1]]   ;;  %s4128_s17 = smov 128  }
  0xa1   : > { %3802 = sst [smem:[#allocation15 + $0x2]] (%p4937_p3), %s4127_s27  ;;  %s4129_s18 = smov 8  }
  0xa2   : > { %3803 = sst [smem:[#allocation15 + $0x3]] (%p4937_p3), %s4128_s17  ;;  %s262_s19 = scalar_lea.sflag [#allocation3], %s261_s28 }
  0xa3   : > { %3804 = sst [smem:[#allocation15 + $0x4]] (%p4937_p3), %s4128_s17  ;;  %s4130_s14 = smov [#allocation14]  }
  0xa4   : > { %3805 = sst [smem:[#allocation15 + $0x5]] (%p4937_p3), %s4129_s18 }
  0xa6   : > { %s2759_s26 = sshll.u32 %s277_s29, 26 }
  0xa7   : > { %s2760_s16 = sadd.s32 134217728, %s2759_s26 }
  0xa8   : > { %3806 = dma.general (%p4937_p3), %s272_s20, 20480, %s286_s15, %s262_s19, %s4130_s14, [#allocation15], %s2760_s16, 0  }
  0xa9 PF: > { %p4938_p2 = scmp.ne.s32.totalorder %s4933_s11, 0 }
  0xaa   : > { %s4380_s30 = sand.u32 (!%p4938_p2), 1, %s4108_s22   ;;  %p4939_p5 = scmp.ne.s32.totalorder (!%p4938_p2), %s4929_s8, 0 }
  0xab   : > { %310 = sbr.rel (%p4938_p2) target bundleno = 822 (0x336), region = 44  ;;  %s313_s10 = scalar_lea.sflag (!%p4938_p2), [#allocation3], %s4380_s30 }
  0xac   : > { %s3788_s1 = smul.u32 (!%p4938_p2), 1280, %s4380_s30 }
  0xae   : > { %s4384_s21 = scalar_lea.vmem (!%p4938_p2), [#allocation2], %s3788_s1 }
  0xb2   : > { %4083 = dma.done.wait (%p4939_p5), %s313_s10, 20480  }
  0xb3   : > { %4085 = vsyncadd (%p4939_p5), %s313_s10, 4294946816  ;;  %p4940_p6 = scmp.eq.s32.totalorder %s4190_s25, 0 }
  0xb5   : > { %4087 = dma.done.wait (%p4940_p6), [#allocation6], 2576   ;;  %p4941_p11 = pmov %p4940_p6 }
  0xb6   : > { %p4942_p12 = pmov %p4940_p6 }
  0xb7   : > { %4089 = vsyncadd (%p4941_p11), [#allocation6], 4294964720 }
  0xb8   : > { %4091 = dma.done.wait (%p4942_p12), [#allocation9], 2304   ;;  %p4943_p13 = pmov %p4940_p6 }
  0xb9   : > { %p4944_p0 = pmov %p4940_p6 }
  0xba   : > { %4093 = vsyncadd (%p4943_p13), [#allocation9], 4294964992 }
  0xbb   : > { %4095 = dma.done.wait (%p4944_p0), [#allocation12], 16   ;;  %p4945_p7 = pmov %p4944_p0 }
  0xbc   : > { %vm441_vm0 = vcmask 261120   ;;  %v437_v0 = vld [vmem:[#allocation5 + $0x20] sm:$0xff]  ;;  %v438_v1 = vld [vmem:[#allocation5 + $0x28] sm:$0xff]  ;;  %v439_v2 = vld [vmem:[#allocation5 + $0x30] sm:$0xff]  ;;  %vm2513_vm1 = vcmask 1041409   ;;  %vm2515_vm2 = vcmask 1042434  }
  0xbd   : > { %4097 = vsyncadd (%p4945_p7), [#allocation12], 4294967280  ;;  %v3579_v3 = vpack.c.bf16 %v438_v1, %v437_v0  ;;  %v440_v4 = vld [vmem:[#allocation5 + $0x38] sm:$0xff]  ;;  %v2768_v5 = vld [vmem:[%s4384_s21 + $0x100] sm:$0xff]  ;;  %vm2517_vm3 = vcmask 1043459   ;;  %vm2519_vm4 = vcmask 1044484  }
  0xbe   : > { %v2780_v6 = vld [vmem:[%s4384_s21 + $0x160] sm:$0xff]  ;;  %v3583_v7 = vpack.c.bf16 %v440_v4, %v439_v2  ;;  %3272 = vmatprep.mubr.msk.f32.mxu0 %vm441_vm0, %v2768_v5  ;;  %v400_v9 = vld [vmem:[#allocation5 + $0x8] sm:$0xff]  ;;  %v1120_v16 = vld [vmem:[#allocation5 + $0x50] sm:$0xff]  ;;  %vm2521_vm5 = vcmask 1045509   ;;  %vm2523_vm6 = vcmask 1046534   ;;  %vm2525_vm7 = vcmask 1047559  }
  0xbf   : > { %3290 = vmatprep.mubr.msk.f32.mxu1 %vm441_vm0, %v2780_v6  ;;  %v399_v8 = vld [vmem:[#allocation5] sm:$0xff]  ;;  %3580 = vmatprep.subr.bf16.mxu0 %v3579_v3  ;;  %v1119_v11 = vld [vmem:[#allocation5 + $0x48] sm:$0xff]  ;;  %v1121_v17 = vld [vmem:[#allocation5 + $0x58] sm:$0xff]  ;;  %s2767_s7 = sshll.u32 %s4380_s30, 4  ;;  %s3065_s28 = sshll.u32 %s4190_s25, 8 }
  0xc0   : > { %3651 = vmatprep.subr.bf16.mxu1 %v3579_v3  ;;  %v1118_v10 = vld [vmem:[#allocation5 + $0x40] sm:$0xff]  ;;  %3582 = vmatpush3.bf16.msra.mxu0 %v3579_v3  ;;  %v3587_v12 = vpack.c.bf16 %v400_v9, %v399_v8  ;;  %v2769_v14 = vld [vmem:[%s4384_s21 + $0x108] sm:$0xff]  ;;  %v2770_v18 = vld [vmem:[%s4384_s21 + $0x110] sm:$0xff]  ;;  %v4413_v20 = vpack.c.bf16 %v1121_v17, %v1120_v16  ;;  %s364_s8 = scalar_lea.vmem [#allocation13], %s2767_s7  ;;  %s4864_s12 = scalar_lea.hbm %s4914_s6, %s3065_s28 }
  0xc1   : > { %3653 = vmatpush3.bf16.msra.mxu1 %v3579_v3  ;;  %3584 = vmatprep.subr.bf16.mxu0 %v3583_v7  ;;  %v4406_v13 = vpack.c.bf16 %v1119_v11, %v1118_v10  ;;  %v2781_v15 = vld [vmem:[%s4384_s21 + $0x168] sm:$0xff]  ;;  %v2782_v19 = vld [vmem:[%s4384_s21 + $0x170] sm:$0xff]  ;;  %v402_v22 = vld [vmem:[#allocation5 + $0x18] sm:$0xff]  ;;  %s2627_s11 = sshll.u32 %s364_s8, 4  ;;  %s2614_s15 = scalar_lea.sflag [#allocation4], %s4380_s30  ;;  %s4859_s11 = int_to_ptr.vmem [resolvable:$true] %s2627_s11 }
  0xc2   : > { %3652 = vmatprep.subr.bf16.mxu1 %v3583_v7  ;;  %v401_v21 = vld [vmem:[#allocation5 + $0x10] sm:$0xff]  ;;  %v2771_v23 = vld [vmem:[%s4384_s21 + $0x118] sm:$0xff]  ;;  %v2772_v25 = vld [vmem:[%s4384_s21 + $0x120] sm:$0xff]  ;;  %s4038_s13 = scalar_lea.vmem %s4859_s11, 256  ;;  %p4946_p9 = scmp.ne.s32.totalorder %s4930_s9, 0 }
  0xc3   : > { %v2783_v24 = vld [vmem:[%s4384_s21 + $0x178] sm:$0xff]  ;;  %v3591_v26 = vpack.c.bf16 %v402_v22, %v401_v21  ;;  %v2784_v27 = vld [vmem:[%s4384_s21 + $0x180] sm:$0xff]  ;;  %v1510_v29 = vld [vmem:[#allocation5 + $0x68] sm:$0xff]  ;;  %p4039_p8 = scmp.ne.s32.totalorder %s4859_s11, %s4038_s13  ;;  %s4131_s25 = smov [#allocation13]  }
  0xc4   : > { %3586 = vmatpush3.bf16.msra.mxu0 %v3583_v7  ;;  %v1509_v28 = vld [vmem:[#allocation5 + $0x60] sm:$0xff]  ;;  %v2773_v31 = vld [vmem:[%s4384_s21 + $0x128] sm:$0xff]  ;;  %v2774_v33 = vld [vmem:[%s4384_s21 + $0x130] sm:$0xff]  ;;  %s4042_s27 = sshll.u32 %s4131_s25, 4  ;;  %s4043_s27 = int_to_ptr.vmem [resolvable:$false] %s4042_s27 }
  0xc5   : > { %3654 = vmatpush3.bf16.msra.mxu1 %v3583_v7  ;;  %3596 = vmatprep.subr.bf16.mxu0 %v4406_v13  ;;  %v3603_v30 = vpack.c.bf16 %v1510_v29, %v1509_v28  ;;  %v2785_v32 = vld [vmem:[%s4384_s21 + $0x188] sm:$0xff]  ;;  %v2786_v34 = vld [vmem:[%s4384_s21 + $0x190] sm:$0xff]  ;;  %v2775_v35 = vld [vmem:[%s4384_s21 + $0x138] sm:$0xff]  ;;  %p4040_p10 = pnand %p4039_p8, %p4946_p9  ;;  %s4044_s17 = scalar_lea.vmem %s4043_s27, 512 }
  0xc6   : > { %3588 = vmatprep.subr.bf16.mxu1 %v3587_v12  ;;  %v2787_v36 = vld [vmem:[%s4384_s21 + $0x198] sm:$0xff]  ;;  %v2776_v37 = vld [vmem:[%s4384_s21 + $0x140] sm:$0xff]  ;;  %v2777_v39 = vld [vmem:[%s4384_s21 + $0x148] sm:$0xff]  ;;  %p4045_p3 = scmp.lt.s32.totalorder %s4859_s11, %s4043_s27  ;;  %p4046_p2 = scmp.lt.s32.totalorder %s4044_s17, %s4038_s13 }
  0xc7   : > { %3273 = vmatmul.mubr.msk.f32.vlgmr.msra.gmra.mrb[0].mxu0 %vm441_vm0, %v2769_v14  ;;  %v2788_v38 = vld [vmem:[%s4384_s21 + $0x1a0] sm:$0xff]  ;;  %v2789_v40 = vld [vmem:[%s4384_s21 + $0x1a8] sm:$0xff]  ;;  %v2778_v41 = vld [vmem:[%s4384_s21 + $0x150] sm:$0xff]  ;;  %p4041_p1 = pneg %p4040_p10 }
  0xc8   : > { %3291 = vmatmul.mubr.msk.f32.vlgmr.msra.gmra.mrb[0].mxu1 %vm441_vm0, %v2781_v15  ;;  %3598 = vmatpush3.bf16.msra.mxu0 %v4406_v13  ;;  %v2790_v42 = vld [vmem:[%s4384_s21 + $0x1b0] sm:$0xff]  ;;  %v2779_v43 = vld [vmem:[%s4384_s21 + $0x158] sm:$0xff]  ;;  %v2792_v45 = vld [vmem:[%s4384_s21 + $0x1c0] sm:$0xff]  ;;  %p4047_p5 = por %p4046_p2, %p4045_p3 }
  0xc9   : > { %3590 = vmatpush3.bf16.msra.mxu1 %v3587_v12  ;;  %3275 = vmatprep.mubr.msk.f32.mxu0 %vm441_vm0, %v2770_v18  ;;  %v2791_v44 = vld [vmem:[%s4384_s21 + $0x1b8] sm:$0xff]  ;;  %v2864_v46 = vld [vmem:[%s4384_s21 + $0x200] sm:$0xff]  ;;  %v1511_v47 = vld [vmem:[#allocation5 + $0x70] sm:$0xff] }
  0xca   : > { %3293 = vmatprep.mubr.msk.f32.mxu1 %vm441_vm0, %v2782_v19  ;;  %3600 = vmatprep.subr.bf16.mxu0 %v4413_v20  ;;  %v1512_v48 = vld [vmem:[#allocation5 + $0x78] sm:$0xff]  ;;  %v2793_v49 = vld [vmem:[%s4384_s21 + $0x1c8] sm:$0xff]  ;;  %v2794_v51 = vld [vmem:[%s4384_s21 + $0x1d0] sm:$0xff]  ;;  %p4048_p6 = pnand %p4047_p5, %p4041_p1 }
  0xcb   : > { %3592 = vmatprep.subr.bf16.mxu1 %v3591_v26  ;;  %3276 = vmatmul.mubr.msk.f32.gmra.mrb[2].mxu0 %vm441_vm0, %v2771_v23  ;;  %v2865_v50 = vld [vmem:[%s4384_s21 + $0x208] sm:$0xff]  ;;  %v3607_v52 = vpack.c.bf16 %v1512_v48, %v1511_v47  ;;  %v2866_v53 = vld [vmem:[%s4384_s21 + $0x210] sm:$0xff]  ;;  %v1900_v54 = vld [vmem:[#allocation5 + $0x80] sm:$0xff] }
  0xcc   : > { %3294 = vmatmul.mubr.msk.f32.gmra.mrb[2].mxu1 %vm441_vm0, %v2783_v24  ;;  %3278 = vmatprep.mubr.msk.f32.mxu0 %vm441_vm0, %v2772_v25  ;;  %v1901_v55 = vld [vmem:[#allocation5 + $0x88] sm:$0xff]  ;;  %v2795_v56 = vld [vmem:[%s4384_s21 + $0x1d8] sm:$0xff]  ;;  %v2796_v58 = vld [vmem:[%s4384_s21 + $0x1e0] sm:$0xff] }
  0xcd   : > { %3296 = vmatprep.mubr.msk.f32.mxu1 %vm441_vm0, %v2784_v27  ;;  %3602 = vmatpush3.bf16.msra.mxu0 %v4413_v20  ;;  %v2867_v57 = vld [vmem:[%s4384_s21 + $0x218] sm:$0xff]  ;;  %v3611_v59 = vpack.c.bf16 %v1901_v55, %v1900_v54  ;;  %v2928_v60 = vld [vmem:[%s4384_s21 + $0x300] sm:$0xff]  ;;  %v1902_v61 = vld [vmem:[#allocation5 + $0x90] sm:$0xff] }
  0xce   : > { %3594 = vmatpush3.bf16.msra.mxu1 %v3591_v26  ;;  %3604 = vmatprep.subr.bf16.mxu0 %v3603_v30  ;;  %v1903_v62 = vld [vmem:[#allocation5 + $0x98] sm:$0xff]  ;;  %v2797_v63 = vld [vmem:[%s4384_s21 + $0x1e8] sm:$0xff]  ;;  %v2798_v1 = vld [vmem:[%s4384_s21 + $0x1f0] sm:$0xff] }
  0xcf   : > { %3655 = vmatprep.subr.bf16.mxu1 %v4406_v13  ;;  %3279 = vmatmul.mubr.msk.f32.gmra.mrb[4].mxu0 %vm441_vm0, %v2773_v31  ;;  %v2929_v0 = vld [vmem:[%s4384_s21 + $0x308] sm:$0xff]  ;;  %v3615_v2 = vpack.c.bf16 %v1903_v62, %v1902_v61  ;;  %v2930_v3 = vld [vmem:[%s4384_s21 + $0x310] sm:$0xff]  ;;  %v2799_v4 = vld [vmem:[%s4384_s21 + $0x1f8] sm:$0xff] }
  0xd0   : > { %3297 = vmatmul.mubr.msk.f32.gmra.mrb[4].mxu1 %vm441_vm0, %v2785_v32  ;;  %3281 = vmatprep.mubr.msk.f32.mxu0 %vm441_vm0, %v2774_v33  ;;  %v2931_v5 = vld [vmem:[%s4384_s21 + $0x318] sm:$0xff]  ;;  %v367_v6 = vld [vmem:[%s4384_s21] sm:$0xff]  ;;  %v368_v8 = vld [vmem:[%s4384_s21 + $0x8] sm:$0xff] }
  0xd1   : > { %3299 = vmatprep.mubr.msk.f32.mxu1 %vm441_vm0, %v2786_v34  ;;  %v2932_v7 = vld [vmem:[%s4384_s21 + $0x320] sm:$0xff]  ;;  %v2933_v9 = vld [vmem:[%s4384_s21 + $0x328] sm:$0xff]  ;;  %v369_v10 = vld [vmem:[%s4384_s21 + $0x10] sm:$0xff] }
  0xd2   : > { %v2934_v11 = vld [vmem:[%s4384_s21 + $0x330] sm:$0xff]  ;;  %v370_v12 = vld [vmem:[%s4384_s21 + $0x18] sm:$0xff]  ;;  %v371_v15 = vld [vmem:[%s4384_s21 + $0x20] sm:$0xff] }
  0xd3   : > { %3282 = vmatmul.mubr.msk.f32.gmra.mrb[6].mxu0 %vm441_vm0, %v2775_v35  ;;  %v2935_v14 = vld [vmem:[%s4384_s21 + $0x338] sm:$0xff]  ;;  %v2936_v16 = vld [vmem:[%s4384_s21 + $0x340] sm:$0xff]  ;;  %v2937_v17 = vld [vmem:[%s4384_s21 + $0x348] sm:$0xff] }
  0xd4   : > { %3300 = vmatmul.mubr.msk.f32.gmra.mrb[6].mxu1 %vm441_vm0, %v2787_v36  ;;  %3284 = vmatprep.mubr.msk.f32.mxu0 %vm441_vm0, %v2776_v37  ;;  %v373_v18 = vld [vmem:[%s4384_s21 + $0x30] sm:$0xff]  ;;  %v374_v21 = vld [vmem:[%s4384_s21 + $0x38] sm:$0xff]  ;;  %v375_v23 = vld [vmem:[%s4384_s21 + $0x40] sm:$0xff] }
  0xd5   : > { %3302 = vmatprep.mubr.msk.f32.mxu1 %vm441_vm0, %v2788_v38  ;;  %v2938_v19 = vld [vmem:[%s4384_s21 + $0x350] sm:$0xff]  ;;  %v2939_v22 = vld [vmem:[%s4384_s21 + $0x358] sm:$0xff]  ;;  %v2940_v24 = vld [vmem:[%s4384_s21 + $0x360] sm:$0xff] }
  0xd6   : > { %v2941_v25 = vld [vmem:[%s4384_s21 + $0x368] sm:$0xff]  ;;  %v377_v26 = vld [vmem:[%s4384_s21 + $0x50] sm:$0xff]  ;;  %v378_v28 = vld [vmem:[%s4384_s21 + $0x58] sm:$0xff] }
  0xd7   : > { %3285 = vmatmul.mubr.msk.f32.gmra.mrb[8].mxu0 %vm441_vm0, %v2777_v39  ;;  %v2942_v27 = vld [vmem:[%s4384_s21 + $0x370] sm:$0xff]  ;;  %v2943_v29 = vld [vmem:[%s4384_s21 + $0x378] sm:$0xff]  ;;  %v2944_v31 = vld [vmem:[%s4384_s21 + $0x380] sm:$0xff] }
  0xd8   : > { %3303 = vmatmul.mubr.msk.f32.gmra.mrb[8].mxu1 %vm441_vm0, %v2789_v40  ;;  %3287 = vmatprep.mubr.msk.f32.mxu0 %vm441_vm0, %v2778_v41  ;;  %v380_v32 = vld [vmem:[%s4384_s21 + $0x68] sm:$0xff]  ;;  %v381_v34 = vld [vmem:[%s4384_s21 + $0x70] sm:$0xff]  ;;  %v382_v36 = vld [vmem:[%s4384_s21 + $0x78] sm:$0xff] }
  0xd9   : > { %3305 = vmatprep.mubr.msk.f32.mxu1 %vm441_vm0, %v2790_v42  ;;  %v2945_v33 = vld [vmem:[%s4384_s21 + $0x388] sm:$0xff]  ;;  %v2946_v35 = vld [vmem:[%s4384_s21 + $0x390] sm:$0xff]  ;;  %v2947_v37 = vld [vmem:[%s4384_s21 + $0x398] sm:$0xff] }
  0xda   : > { %v383_v38 = vld [vmem:[%s4384_s21 + $0x80] sm:$0xff]  ;;  %v384_v40 = vld [vmem:[%s4384_s21 + $0x88] sm:$0xff]  ;;  %v385_v42 = vld [vmem:[%s4384_s21 + $0x90] sm:$0xff] }
  0xdb   : > { %3288 = vmatmul.mubr.msk.f32.gmra.mrb[10].mxu0 %vm441_vm0, %v2779_v43  ;;  %v2948_v39 = vld [vmem:[%s4384_s21 + $0x3a0] sm:$0xff]  ;;  %v2949_v41 = vld [vmem:[%s4384_s21 + $0x3a8] sm:$0xff]  ;;  %v2950_v43 = vld [vmem:[%s4384_s21 + $0x3b0] sm:$0xff] }
  0xdc   : > { %3306 = vmatmul.mubr.msk.f32.gmra.mrb[10].mxu1 %vm441_vm0, %v2791_v44  ;;  %3384 = vmatprep.mubr.msk.f32.mxu0 %vm441_vm0, %v2864_v46  ;;  %v386_v44 = vld [vmem:[%s4384_s21 + $0x98] sm:$0xff]  ;;  %v387_v46 = vld [vmem:[%s4384_s21 + $0xa0] sm:$0xff]  ;;  %v388_v48 = vld [vmem:[%s4384_s21 + $0xa8] sm:$0xff] }
  0xdd   : > { %3308 = vmatprep.mubr.msk.f32.mxu1 %vm441_vm0, %v2792_v45  ;;  %v2951_v45 = vld [vmem:[%s4384_s21 + $0x3b8] sm:$0xff]  ;;  %v2952_v47 = vld [vmem:[%s4384_s21 + $0x3c0] sm:$0xff] }
  0xde   : > { %v391_v54 = vld [vmem:[%s4384_s21 + $0xc0] sm:$0xff]  ;;  %v2959_v61 = vld [vmem:[%s4384_s21 + $0x3f8] sm:$0xff] }
  0xdf   : > { %3385 = vmatmul.mubr.msk.f32.vlgmr.msra.gmra.mrb[12].mxu0 %vm441_vm0, %v2865_v50  ;;  %v389_v50 = vld [vmem:[%s4384_s21 + $0xb0] sm:$0xff]  ;;  %v2956_v55 = vld [vmem:[%s4384_s21 + $0x3e0] sm:$0xff] }
  0xe0   : > { %3309 = vmatmul.mubr.msk.f32.gmra.mrb[12].mxu1 %vm441_vm0, %v2793_v49  ;;  %3606 = vmatpush3.bf16.msra.mxu0 %v3603_v30  ;;  %v379_v30 = vld [vmem:[%s4384_s21 + $0x60] sm:$0xff]  ;;  %v2953_v49 = vld [vmem:[%s4384_s21 + $0x3c8] sm:$0xff] }
  0xe1   : > { %3311 = vmatprep.mubr.msk.f32.mxu1 %vm441_vm0, %v2794_v51  ;;  %3387 = vmatprep.mubr.msk.f32.mxu0 %vm441_vm0, %v2866_v53  ;;  %v2954_v51 = vld [vmem:[%s4384_s21 + $0x3d0] sm:$0xff]  ;;  %v2955_v53 = vld [vmem:[%s4384_s21 + $0x3d8] sm:$0xff]  ;;  %v395_v62 = vld [vmem:[%s4384_s21 + $0xe0] sm:$0xff] }
  0xe2   : > { %3608 = vmatprep.subr.bf16.mxu0 %v3607_v52 }
  0xe3   : > { %3388 = vmatmul.mubr.msk.f32.gmra.mrb[14].mxu0 %vm441_vm0, %v2867_v57  ;;  %v2957_v57 = vld [vmem:[%s4384_s21 + $0x3e8] sm:$0xff] }
  0xe4   : > { %3312 = vmatmul.mubr.msk.f32.gmra.mrb[14].mxu1 %vm441_vm0, %v2795_v56  ;;  %3610 = vmatpush3.bf16.msra.mxu0 %v3607_v52  ;;  %v390_v52 = vld [vmem:[%s4384_s21 + $0xb8] sm:$0xff]  ;;  %v392_v56 = vld [vmem:[%s4384_s21 + $0xc8] sm:$0xff] }
  0xe5   : > { %3314 = vmatprep.mubr.msk.f32.mxu1 %vm441_vm0, %v2796_v58  ;;  %3440 = vmatprep.mubr.msk.f32.mxu0 %vm441_vm0, %v2928_v60  ;;  %v393_v58 = vld [vmem:[%s4384_s21 + $0xd0] sm:$0xff]  ;;  %v394_v60 = vld [vmem:[%s4384_s21 + $0xd8] sm:$0xff] }
  0xe6   : > { %3612 = vmatprep.subr.bf16.mxu0 %v3611_v59 }
  0xe7   : > { %3441 = vmatmul.mubr.msk.f32.vlgmr.msra.gmra.mrb[12].mxu0 %vm441_vm0, %v2929_v0  ;;  %v396_v0 = vld [vmem:[%s4384_s21 + $0xe8] sm:$0xff] }
  0xe8   : > { %3315 = vmatmul.mubr.msk.f32.gmra.mrb[16].mxu1 %vm441_vm0, %v2797_v63  ;;  %3614 = vmatpush3.bf16.msra.mxu0 %v3611_v59  ;;  %v2958_v59 = vld [vmem:[%s4384_s21 + $0x3f0] sm:$0xff]  ;;  %v2992_v63 = vld [vmem:[%s4384_s21 + $0x400] sm:$0xff] }
  0xe9   : > { %3317 = vmatprep.mubr.msk.f32.mxu1 %vm441_vm0, %v2798_v1  ;;  %3443 = vmatprep.mubr.msk.f32.mxu0 %vm441_vm0, %v2930_v3  ;;  %v2993_v1 = vld [vmem:[%s4384_s21 + $0x408] sm:$0xff]  ;;  %v2994_v3 = vld [vmem:[%s4384_s21 + $0x410] sm:$0xff] }
  0xea   : > { %3616 = vmatprep.subr.bf16.mxu0 %v3615_v2 }
  0xeb   : > { %3444 = vmatmul.mubr.msk.f32.gmra.mrb[14].mxu0 %vm441_vm0, %v2931_v5  ;;  %v2995_v5 = vld [vmem:[%s4384_s21 + $0x418] sm:$0xff] }
  0xec   : > { %3318 = vmatmul.mubr.msk.f32.gmra.mrb[18].mxu1 %vm441_vm0, %v2799_v4  ;;  %3446 = vmatprep.mubr.msk.f32.mxu0 %vm441_vm0, %v2932_v7  ;;  %v398_v4 = vld [vmem:[%s4384_s21 + $0xf8] sm:$0xff]  ;;  %v2996_v7 = vld [vmem:[%s4384_s21 + $0x420] sm:$0xff] }
  0xed   : > { %3328 = vmatprep.mubr.msk.f32.mxu1 %vm441_vm0, %v367_v6  ;;  %3618 = vmatpush3.bf16.msra.mxu0 %v3615_v2  ;;  %v397_v2 = vld [vmem:[%s4384_s21 + $0xf0] sm:$0xff]  ;;  %v2868_v6 = vld [vmem:[%s4384_s21 + $0x220] sm:$0xff] }
  0xef   : > { %3447 = vmatmul.mubr.msk.f32.gmra.mrb[16].mxu0 %vm441_vm0, %v2933_v9  ;;  %v2997_v9 = vld [vmem:[%s4384_s21 + $0x428] sm:$0xff] }
  0xf0   : > { %3329 = vmatmul.mubr.msk.f32.vlgmr.msra.gmra.mrb[20].mxu1 %vm441_vm0, %v368_v8  ;;  %3449 = vmatprep.mubr.msk.f32.mxu0 %vm441_vm0, %v2934_v11  ;;  %v2869_v8 = vld [vmem:[%s4384_s21 + $0x228] sm:$0xff]  ;;  %v2998_v11 = vld [vmem:[%s4384_s21 + $0x430] sm:$0xff] }
  0xf1   : > { %3657 = vmatpush3.bf16.msra.mxu1 %v4406_v13  ;;  %3331 = vmatprep.mubr.msk.f32.mxu1 %vm441_vm0, %v369_v10  ;;  %v372_v13 = vld [vmem:[%s4384_s21 + $0x28] sm:$0xff]  ;;  %v2870_v10 = vld [vmem:[%s4384_s21 + $0x230] sm:$0xff] }
  0xf2   : > { %3656 = vmatprep.subr.bf16.mxu1 %v4413_v20 }
  0xf3   : > { %3450 = vmatmul.mubr.msk.f32.gmra.mrb[18].mxu0 %vm441_vm0, %v2935_v14  ;;  %v2999_v14 = vld [vmem:[%s4384_s21 + $0x438] sm:$0xff] }
  0xf4   : > { %3332 = vmatmul.mubr.msk.f32.gmra.mrb[22].mxu1 %vm441_vm0, %v370_v12  ;;  %3452 = vmatprep.mubr.msk.f32.mxu0 %vm441_vm0, %v2936_v16  ;;  %v2871_v12 = vld [vmem:[%s4384_s21 + $0x238] sm:$0xff]  ;;  %v3000_v16 = vld [vmem:[%s4384_s21 + $0x440] sm:$0xff] }
  0xf5   : > { %3334 = vmatprep.mubr.msk.f32.mxu1 %vm441_vm0, %v371_v15  ;;  %3658 = vmatpush3.bf16.msra.mxu1 %v4413_v20  ;;  %v376_v20 = vld [vmem:[%s4384_s21 + $0x48] sm:$0xff]  ;;  %v2872_v15 = vld [vmem:[%s4384_s21 + $0x240] sm:$0xff] }
  0xf7   : > { %3453 = vmatmul.mubr.msk.f32.gmra.mrb[20].mxu0 %vm441_vm0, %v2937_v17  ;;  %v3001_v17 = vld [vmem:[%s4384_s21 + $0x448] sm:$0xff] }
  0xf8   : > { %3335 = vmatmul.mubr.msk.f32.gmra.mrb[24].mxu1 %vm441_vm0, %v372_v13  ;;  %3455 = vmatprep.mubr.msk.f32.mxu0 %vm441_vm0, %v2938_v19  ;;  %v2873_v13 = vld [vmem:[%s4384_s21 + $0x248] sm:$0xff]  ;;  %v3002_v19 = vld [vmem:[%s4384_s21 + $0x450] sm:$0xff] }
  0xf9   : > { %3337 = vmatprep.mubr.msk.f32.mxu1 %vm441_vm0, %v373_v18  ;;  %v2874_v18 = vld [vmem:[%s4384_s21 + $0x250] sm:$0xff] }
  0xfb   : > { %3456 = vmatmul.mubr.msk.f32.gmra.mrb[22].mxu0 %vm441_vm0, %v2939_v22  ;;  %v3003_v22 = vld [vmem:[%s4384_s21 + $0x458] sm:$0xff] }
  0xfc   : > { %3338 = vmatmul.mubr.msk.f32.gmra.mrb[26].mxu1 %vm441_vm0, %v374_v21  ;;  %3458 = vmatprep.mubr.msk.f32.mxu0 %vm441_vm0, %v2940_v24  ;;  %v2875_v21 = vld [vmem:[%s4384_s21 + $0x258] sm:$0xff]  ;;  %v3004_v24 = vld [vmem:[%s4384_s21 + $0x460] sm:$0xff] }
  0xfd   : > { %3340 = vmatprep.mubr.msk.f32.mxu1 %vm441_vm0, %v375_v23  ;;  %v2876_v23 = vld [vmem:[%s4384_s21 + $0x260] sm:$0xff] }
  0xff   : > { %3459 = vmatmul.mubr.msk.f32.gmra.mrb[24].mxu0 %vm441_vm0, %v2941_v25  ;;  %v3005_v25 = vld [vmem:[%s4384_s21 + $0x468] sm:$0xff] }
 0x100   : > { %3341 = vmatmul.mubr.msk.f32.gmra.mrb[28].mxu1 %vm441_vm0, %v376_v20  ;;  %3461 = vmatprep.mubr.msk.f32.mxu0 %vm441_vm0, %v2942_v27  ;;  %v2877_v20 = vld [vmem:[%s4384_s21 + $0x268] sm:$0xff]  ;;  %v3006_v27 = vld [vmem:[%s4384_s21 + $0x470] sm:$0xff] }
 0x101   : > { %3343 = vmatprep.mubr.msk.f32.mxu1 %vm441_vm0, %v377_v26  ;;  %v2878_v26 = vld [vmem:[%s4384_s21 + $0x270] sm:$0xff] }
 0x103   : > { %3462 = vmatmul.mubr.msk.f32.gmra.mrb[26].mxu0 %vm441_vm0, %v2943_v29  ;;  %v3007_v29 = vld [vmem:[%s4384_s21 + $0x478] sm:$0xff] }
 0x104   : > { %3344 = vmatmul.mubr.msk.f32.gmra.mrb[30].mxu1 %vm441_vm0, %v378_v28  ;;  %3464 = vmatprep.mubr.msk.f32.mxu0 %vm441_vm0, %v2944_v31  ;;  %v2879_v28 = vld [vmem:[%s4384_s21 + $0x278] sm:$0xff]  ;;  %v3008_v31 = vld [vmem:[%s4384_s21 + $0x480] sm:$0xff] }
 0x105   : > { %3346 = vmatprep.mubr.msk.f32.mxu1 %vm441_vm0, %v379_v30  ;;  %v2880_v30 = vld [vmem:[%s4384_s21 + $0x280] sm:$0xff] }
 0x107   : > { %3465 = vmatmul.mubr.msk.f32.gmra.mrb[28].mxu0 %vm441_vm0, %v2945_v33  ;;  %v3009_v33 = vld [vmem:[%s4384_s21 + $0x488] sm:$0xff] }
 0x108   : > { %3347 = vmatmul.mubr.msk.f32.gmra.mrb[0].mxu1 %vm441_vm0, %v380_v32  ;;  %3467 = vmatprep.mubr.msk.f32.mxu0 %vm441_vm0, %v2946_v35  ;;  %v2881_v32 = vld [vmem:[%s4384_s21 + $0x288] sm:$0xff]  ;;  %v3010_v35 = vld [vmem:[%s4384_s21 + $0x490] sm:$0xff] }
 0x109   : > { %3349 = vmatprep.mubr.msk.f32.mxu1 %vm441_vm0, %v381_v34  ;;  %v2882_v34 = vld [vmem:[%s4384_s21 + $0x290] sm:$0xff] }
 0x10b   : > { %3468 = vmatmul.mubr.msk.f32.gmra.mrb[30].mxu0 %vm441_vm0, %v2947_v37  ;;  %v3011_v37 = vld [vmem:[%s4384_s21 + $0x498] sm:$0xff] }
 0x10c   : > { %3350 = vmatmul.mubr.msk.f32.gmra.mrb[2].mxu1 %vm441_vm0, %v382_v36  ;;  %3470 = vmatprep.mubr.msk.f32.mxu0 %vm441_vm0, %v2948_v39  ;;  %v2883_v36 = vld [vmem:[%s4384_s21 + $0x298] sm:$0xff]  ;;  %v3012_v39 = vld [vmem:[%s4384_s21 + $0x4a0] sm:$0xff] }
 0x10d   : > { %3352 = vmatprep.mubr.msk.f32.mxu1 %vm441_vm0, %v383_v38  ;;  %v2884_v38 = vld [vmem:[%s4384_s21 + $0x2a0] sm:$0xff] }
 0x10f   : > { %3471 = vmatmul.mubr.msk.f32.gmra.mrb[32].mxu0 %vm441_vm0, %v2949_v41  ;;  %v3013_v41 = vld [vmem:[%s4384_s21 + $0x4a8] sm:$0xff] }
 0x110   : > { %3353 = vmatmul.mubr.msk.f32.gmra.mrb[4].mxu1 %vm441_vm0, %v384_v40  ;;  %3473 = vmatprep.mubr.msk.f32.mxu0 %vm441_vm0, %v2950_v43  ;;  %v2885_v40 = vld [vmem:[%s4384_s21 + $0x2a8] sm:$0xff]  ;;  %v3014_v43 = vld [vmem:[%s4384_s21 + $0x4b0] sm:$0xff] }
 0x111   : > { %3355 = vmatprep.mubr.msk.f32.mxu1 %vm441_vm0, %v385_v42  ;;  %v2886_v42 = vld [vmem:[%s4384_s21 + $0x2b0] sm:$0xff] }
 0x113   : > { %3474 = vmatmul.mubr.msk.f32.gmra.mrb[34].mxu0 %vm441_vm0, %v2951_v45  ;;  %v3015_v45 = vld [vmem:[%s4384_s21 + $0x4b8] sm:$0xff] }
 0x114   : > { %3356 = vmatmul.mubr.msk.f32.gmra.mrb[6].mxu1 %vm441_vm0, %v386_v44  ;;  %3476 = vmatprep.mubr.msk.f32.mxu0 %vm441_vm0, %v2952_v47  ;;  %v2887_v44 = vld [vmem:[%s4384_s21 + $0x2b8] sm:$0xff]  ;;  %v3016_v47 = vld [vmem:[%s4384_s21 + $0x4c0] sm:$0xff] }
 0x115   : > { %3358 = vmatprep.mubr.msk.f32.mxu1 %vm441_vm0, %v387_v46  ;;  %v2888_v46 = vld [vmem:[%s4384_s21 + $0x2c0] sm:$0xff] }
 0x117   : > { %3477 = vmatmul.mubr.msk.f32.gmra.mrb[36].mxu0 %vm441_vm0, %v2953_v49  ;;  %v3017_v49 = vld [vmem:[%s4384_s21 + $0x4c8] sm:$0xff] }
 0x118   : > { %3359 = vmatmul.mubr.msk.f32.gmra.mrb[8].mxu1 %vm441_vm0, %v388_v48  ;;  %3479 = vmatprep.mubr.msk.f32.mxu0 %vm441_vm0, %v2954_v51  ;;  %v2889_v48 = vld [vmem:[%s4384_s21 + $0x2c8] sm:$0xff]  ;;  %v3018_v51 = vld [vmem:[%s4384_s21 + $0x4d0] sm:$0xff] }
 0x119   : > { %3361 = vmatprep.mubr.msk.f32.mxu1 %vm441_vm0, %v389_v50  ;;  %v2890_v50 = vld [vmem:[%s4384_s21 + $0x2d0] sm:$0xff] }
 0x11b   : > { %3480 = vmatmul.mubr.msk.f32.gmra.mrb[38].mxu0 %vm441_vm0, %v2955_v53  ;;  %v3019_v53 = vld [vmem:[%s4384_s21 + $0x4d8] sm:$0xff] }
 0x11c   : > { %3362 = vmatmul.mubr.msk.f32.gmra.mrb[10].mxu1 %vm441_vm0, %v390_v52  ;;  %3482 = vmatprep.mubr.msk.f32.mxu0 %vm441_vm0, %v2956_v55  ;;  %v2891_v52 = vld [vmem:[%s4384_s21 + $0x2d8] sm:$0xff]  ;;  %v3020_v55 = vld [vmem:[%s4384_s21 + $0x4e0] sm:$0xff] }
 0x11d   : > { %3364 = vmatprep.mubr.msk.f32.mxu1 %vm441_vm0, %v391_v54  ;;  %v2892_v54 = vld [vmem:[%s4384_s21 + $0x2e0] sm:$0xff] }
 0x11f   : > { %3483 = vmatmul.mubr.msk.f32.gmra.mrb[40].mxu0 %vm441_vm0, %v2957_v57  ;;  %v3021_v57 = vld [vmem:[%s4384_s21 + $0x4e8] sm:$0xff] }
 0x120   : > { %3365 = vmatmul.mubr.msk.f32.gmra.mrb[12].mxu1 %vm441_vm0, %v392_v56  ;;  %3485 = vmatprep.mubr.msk.f32.mxu0 %vm441_vm0, %v2958_v59  ;;  %v2893_v56 = vld [vmem:[%s4384_s21 + $0x2e8] sm:$0xff]  ;;  %v3022_v59 = vld [vmem:[%s4384_s21 + $0x4f0] sm:$0xff] }
 0x121   : > { %3367 = vmatprep.mubr.msk.f32.mxu1 %vm441_vm0, %v393_v58  ;;  %v2894_v58 = vld [vmem:[%s4384_s21 + $0x2f0] sm:$0xff] }
 0x123   : > { %3486 = vmatmul.mubr.msk.f32.gmra.mrb[42].mxu0 %vm441_vm0, %v2959_v61  ;;  %v3023_v61 = vld [vmem:[%s4384_s21 + $0x4f8] sm:$0xff] }
 0x124   : > { %3368 = vmatmul.mubr.msk.f32.gmra.mrb[14].mxu1 %vm441_vm0, %v394_v60  ;;  %3496 = vmatprep.mubr.msk.f32.mxu0 %vm441_vm0, %v2992_v63  ;;  %v2895_v60 = vld [vmem:[%s4384_s21 + $0x2f8] sm:$0xff] }
 0x125   : > { %3370 = vmatprep.mubr.msk.f32.mxu1 %vm441_vm0, %v395_v62 }
 0x127   : > { %3497 = vmatmul.mubr.msk.f32.vlgmr.msra.gmra.mrb[12].mxu0 %vm441_vm0, %v2993_v1 }
 0x128   : > { %3371 = vmatmul.mubr.msk.f32.gmra.mrb[16].mxu1 %vm441_vm0, %v396_v0  ;;  %3499 = vmatprep.mubr.msk.f32.mxu0 %vm441_vm0, %v2994_v3 }
 0x129   : > { %3373 = vmatprep.mubr.msk.f32.mxu1 %vm441_vm0, %v397_v2 }
 0x12b   : > { %3500 = vmatmul.mubr.msk.f32.gmra.mrb[14].mxu0 %vm441_vm0, %v2995_v5  ;;  %v2475_v5 = vld [vmem:[#allocation10 + $0x8] sm:$0xff] }
 0x12c   : > { %3374 = vmatmul.mubr.msk.f32.gmra.mrb[18].mxu1 %vm441_vm0, %v398_v4  ;;  %3502 = vmatprep.mubr.msk.f32.mxu0 %vm441_vm0, %v2996_v7  ;;  %v2474_v4 = vld [vmem:[#allocation10] sm:$0xff] }
 0x12d   : > { %3390 = vmatprep.mubr.msk.f32.mxu1 %vm441_vm0, %v2868_v6  ;;  %v3619_v7 = vpack.c.bf16 %v2475_v5, %v2474_v4 }
 0x12f   : > { %3503 = vmatmul.mubr.msk.f32.gmra.mrb[16].mxu0 %vm441_vm0, %v2997_v9  ;;  %3620 = vmatprep.subr.bf16.mxu1 %v3619_v7 }
 0x130   : > { %3391 = vmatmul.mubr.msk.f32.vlgmr.msra.gmra.mrb[24].mxu1 %vm441_vm0, %v2869_v8  ;;  %3505 = vmatprep.mubr.msk.f32.mxu0 %vm441_vm0, %v2998_v11 }
 0x131   : > { %3393 = vmatprep.mubr.msk.f32.mxu1 %vm441_vm0, %v2870_v10  ;;  %3622 = vmatpush3.bf16.msra.mxu1 %v3619_v7 }
 0x133   : > { %3506 = vmatmul.mubr.msk.f32.gmra.mrb[18].mxu0 %vm441_vm0, %v2999_v14  ;;  %v2476_v14 = vld [vmem:[#allocation10 + $0x10] sm:$0xff] }
 0x134   : > { %3394 = vmatmul.mubr.msk.f32.gmra.mrb[26].mxu1 %vm441_vm0, %v2871_v12  ;;  %3508 = vmatprep.mubr.msk.f32.mxu0 %vm441_vm0, %v3000_v16 }
 0x135   : > { %3396 = vmatprep.mubr.msk.f32.mxu1 %vm441_vm0, %v2872_v15  ;;  %v2477_v15 = vld [vmem:[#allocation10 + $0x18] sm:$0xff] }
 0x136   : > { %v3623_v16 = vpack.c.bf16 %v2477_v15, %v2476_v14 }
 0x137   : > { %3509 = vmatmul.mubr.msk.f32.gmra.mrb[20].mxu0 %vm441_vm0, %v3001_v17  ;;  %v2479_v17 = vld [vmem:[#allocation10 + $0x28] sm:$0xff] }
 0x138   : > { %3397 = vmatmul.mubr.msk.f32.gmra.mrb[28].mxu1 %vm441_vm0, %v2873_v13  ;;  %3511 = vmatprep.mubr.msk.f32.mxu0 %vm441_vm0, %v3002_v19  ;;  %v2478_v13 = vld [vmem:[#allocation10 + $0x20] sm:$0xff]  ;;  %v2480_v19 = vld [vmem:[#allocation10 + $0x30] sm:$0xff] }
 0x139   : > { %3399 = vmatprep.mubr.msk.f32.mxu1 %vm441_vm0, %v2874_v18  ;;  %3624 = vmatprep.subr.bf16.mxu1 %v3623_v16  ;;  %v3627_v18 = vpack.c.bf16 %v2479_v17, %v2478_v13 }
 0x13a   : > { %3626 = vmatpush3.bf16.msra.mxu1 %v3623_v16 }
 0x13b   : > { %3512 = vmatmul.mubr.msk.f32.gmra.mrb[22].mxu0 %vm441_vm0, %v3003_v22  ;;  %3628 = vmatprep.subr.bf16.mxu1 %v3627_v18 }
 0x13c   : > { %3400 = vmatmul.mubr.msk.f32.gmra.mrb[30].mxu1 %vm441_vm0, %v2875_v21  ;;  %3514 = vmatprep.mubr.msk.f32.mxu0 %vm441_vm0, %v3004_v24  ;;  %v2481_v21 = vld [vmem:[#allocation10 + $0x38] sm:$0xff] }
 0x13d   : > { %3402 = vmatprep.mubr.msk.f32.mxu1 %vm441_vm0, %v2876_v23  ;;  %v3631_v22 = vpack.c.bf16 %v2481_v21, %v2480_v19 }
 0x13e   : > { %3630 = vmatpush3.bf16.msra.mxu1 %v3627_v18 }
 0x13f   : > { %3515 = vmatmul.mubr.msk.f32.gmra.mrb[24].mxu0 %vm441_vm0, %v3005_v25  ;;  %3632 = vmatprep.subr.bf16.mxu1 %v3631_v22 }
 0x140   : > { %3403 = vmatmul.mubr.msk.f32.gmra.mrb[0].mxu1 %vm441_vm0, %v2877_v20  ;;  %3517 = vmatprep.mubr.msk.f32.mxu0 %vm441_vm0, %v3006_v27 }
 0x141   : > { %3405 = vmatprep.mubr.msk.f32.mxu1 %vm441_vm0, %v2878_v26 }
 0x142   : > { %3634 = vmatpush3.bf16.msra.mxu1 %v3631_v22 }
 0x143   : > { %3518 = vmatmul.mubr.msk.f32.gmra.mrb[26].mxu0 %vm441_vm0, %v3007_v29 }
 0x144   : > { %3406 = vmatmul.mubr.msk.f32.gmra.mrb[2].mxu1 %vm441_vm0, %v2879_v28  ;;  %3520 = vmatprep.mubr.msk.f32.mxu0 %vm441_vm0, %v3008_v31  ;;  %v2483_v31 = vld [vmem:[#allocation10 + $0x48] sm:$0xff] }
 0x145   : > { %3408 = vmatprep.mubr.msk.f32.mxu1 %vm441_vm0, %v2880_v30  ;;  %v2482_v30 = vld [vmem:[#allocation10 + $0x40] sm:$0xff] }
 0x147   : > { %3521 = vmatmul.mubr.msk.f32.gmra.mrb[28].mxu0 %vm441_vm0, %v3009_v33  ;;  %v3635_v33 = vpack.c.bf16 %v2483_v31, %v2482_v30 }
 0x148   : > { %3409 = vmatmul.mubr.msk.f32.gmra.mrb[4].mxu1 %vm441_vm0, %v2881_v32  ;;  %3523 = vmatprep.mubr.msk.f32.mxu0 %vm441_vm0, %v3010_v35  ;;  %v2484_v32 = vld [vmem:[#allocation10 + $0x50] sm:$0xff] }
 0x149   : > { %3411 = vmatprep.mubr.msk.f32.mxu1 %vm441_vm0, %v2882_v34  ;;  %v2485_v34 = vld [vmem:[#allocation10 + $0x58] sm:$0xff]  ;;  %3636 = vmatprep.subr.bf16.mxu1 %v3635_v33 }
 0x14a   : > { %v3639_v35 = vpack.c.bf16 %v2485_v34, %v2484_v32  ;;  %3638 = vmatpush3.bf16.msra.mxu1 %v3635_v33 }
 0x14b   : > { %3524 = vmatmul.mubr.msk.f32.gmra.mrb[30].mxu0 %vm441_vm0, %v3011_v37  ;;  %v2487_v37 = vld [vmem:[#allocation10 + $0x68] sm:$0xff] }
 0x14c   : > { %3412 = vmatmul.mubr.msk.f32.gmra.mrb[6].mxu1 %vm441_vm0, %v2883_v36  ;;  %3526 = vmatprep.mubr.msk.f32.mxu0 %vm441_vm0, %v3012_v39  ;;  %v2486_v36 = vld [vmem:[#allocation10 + $0x60] sm:$0xff]  ;;  %v2488_v39 = vld [vmem:[#allocation10 + $0x70] sm:$0xff] }
 0x14d   : > { %3414 = vmatprep.mubr.msk.f32.mxu1 %vm441_vm0, %v2884_v38  ;;  %3640 = vmatprep.subr.bf16.mxu1 %v3639_v35  ;;  %v3643_v38 = vpack.c.bf16 %v2487_v37, %v2486_v36 }
 0x14e   : > { %3642 = vmatpush3.bf16.msra.mxu1 %v3639_v35 }
 0x14f   : > { %3527 = vmatmul.mubr.msk.f32.gmra.mrb[32].mxu0 %vm441_vm0, %v3013_v41  ;;  %3644 = vmatprep.subr.bf16.mxu1 %v3643_v38 }
 0x150   : > { %3415 = vmatmul.mubr.msk.f32.gmra.mrb[8].mxu1 %vm441_vm0, %v2885_v40  ;;  %3529 = vmatprep.mubr.msk.f32.mxu0 %vm441_vm0, %v3014_v43  ;;  %v2489_v40 = vld [vmem:[#allocation10 + $0x78] sm:$0xff]  ;;  %v4750_v43 = vld [vmem:[#allocation7] ss:$0 sm:$0xff] }
 0x151   : > { %3417 = vmatprep.mubr.msk.f32.mxu1 %vm441_vm0, %v2886_v42  ;;  %v3647_v41 = vpack.c.bf16 %v2489_v40, %v2488_v39 }
 0x152   : > { %3646 = vmatpush3.bf16.msra.mxu1 %v3643_v38 }
 0x153   : > { %3530 = vmatmul.mubr.msk.f32.gmra.mrb[34].mxu0 %vm441_vm0, %v3015_v45  ;;  %3648 = vmatprep.subr.bf16.mxu1 %v3647_v41 }
 0x154   : > { %3418 = vmatmul.mubr.msk.f32.gmra.mrb[10].mxu1 %vm441_vm0, %v2887_v44  ;;  %3532 = vmatprep.mubr.msk.f32.mxu0 %vm441_vm0, %v3016_v47 }
 0x155   : > { %3420 = vmatprep.mubr.msk.f32.mxu1 %vm441_vm0, %v2888_v46 }
 0x156   : > { %3650 = vmatpush3.bf16.msra.mxu1 %v3647_v41 }
 0x157   : > { %3533 = vmatmul.mubr.msk.f32.gmra.mrb[36].mxu0 %vm441_vm0, %v3017_v49 }
 0x158   : > { %3421 = vmatmul.mubr.msk.f32.gmra.mrb[12].mxu1 %vm441_vm0, %v2889_v48  ;;  %3535 = vmatprep.mubr.msk.f32.mxu0 %vm441_vm0, %v3018_v51  ;;  %v4753_v48 = vld [vmem:[#allocation8 + $0x8] sm:$0xff] }
 0x159   : > { %3423 = vmatprep.mubr.msk.f32.mxu1 %vm441_vm0, %v2890_v50 }
 0x15b   : > { %3536 = vmatmul.mubr.msk.f32.gmra.mrb[38].mxu0 %vm441_vm0, %v3019_v53 }
 0x15c   : > { %3424 = vmatmul.mubr.msk.f32.gmra.mrb[14].mxu1 %vm441_vm0, %v2891_v52  ;;  %3538 = vmatprep.mubr.msk.f32.mxu0 %vm441_vm0, %v3020_v55  ;;  %v4756_v52 = vld [vmem:[#allocation8] sm:$0xff] }
 0x15d   : > { %3426 = vmatprep.mubr.msk.f32.mxu1 %vm441_vm0, %v2892_v54 }
 0x15f   : > { %3539 = vmatmul.mubr.msk.f32.gmra.mrb[40].mxu0 %vm441_vm0, %v3021_v57 }
 0x160   : > { %3427 = vmatmul.mubr.msk.f32.gmra.mrb[16].mxu1 %vm441_vm0, %v2893_v56  ;;  %3541 = vmatprep.mubr.msk.f32.mxu0 %vm441_vm0, %v3022_v59 }
 0x161   : > { %3429 = vmatprep.mubr.msk.f32.mxu1 %vm441_vm0, %v2894_v58 }
 0x163   : > { %3542 = vmatmul.mubr.msk.f32.gmra.mrb[42].mxu0 %vm441_vm0, %v3023_v61 }
 0x164   : > { %3430 = vmatmul.mubr.msk.f32.gmra.mrb[18].mxu1 %vm441_vm0, %v2895_v60 }
 0x19a   : > { %v3274_v62 = vpop.f32.mrb[0].mxu0 }
 0x19b   : > { %v604_v63 = vpop.f32.mrb[1].mxu0 }
 0x19e   : > { %v3277_v0 = vpop.f32.mrb[2].mxu0 }
 0x19f   : > { %v614_v1 = vpop.f32.mrb[3].mxu0 }
 0x1a2   : > { %v4734_v2 = vpop.f32.mrb[4].mxu0 }
 0x1a3   : > { %v4736_v3 = vpop.f32.mrb[5].mxu0 }
 0x1a6   : > { %v4738_v6 = vpop.f32.mrb[6].mxu0 }
 0x1a7   : > { %v4740_v8 = vpop.f32.mrb[7].mxu0 }
 0x1aa   : > { %v4742_v9 = vpop.f32.mrb[8].mxu0 }
 0x1ab   : > { %v4744_v10 = vpop.f32.mrb[9].mxu0 }
 0x1ae   : > { %v4746_v11 = vpop.f32.mrb[10].mxu0 }
 0x1af   : > { %v4748_v12 = vpop.f32.mrb[11].mxu0 }
 0x1c3   : > { %v3330_v23 = vpop.f32.mrb[20].mxu1 }
 0x1c4   : > { %v931_v24 = vadd.f32 %v3330_v23, %v3274_v62  ;;  %v925_v20 = vpop.f32.mrb[21].mxu1 }
 0x1c5   : > { %v926_v25 = vadd.f32 %v925_v20, %v604_v63 }
 0x1c7   : > { %v3333_v26 = vpop.f32.mrb[22].mxu1 }
 0x1c8   : > { %v941_v27 = vadd.f32 %v3333_v26, %v3277_v0  ;;  %v935_v28 = vpop.f32.mrb[23].mxu1 }
 0x1c9   : > { %v936_v29 = vadd.f32 %v935_v28, %v614_v1 }
 0x1fa   : > { %v3498_v42 = vpop.f32.mrb[12].mxu0 }
 0x1fb   : > { %v3660_v44 = vadd.f32 %v3498_v42, %v931_v24  ;;  %v2066_v45 = vpop.f32.mrb[13].mxu0 }
 0x1fc   : > { %v3662_v46 = vadd.f32 %v2066_v45, %v926_v25 }
 0x1fd   : > { %v2265_v47 = vadd.f32 %v3660_v44, %v4750_v43 }
 0x1fe   : > { %v2264_v49 = vadd.f32 %v3662_v46, %v4750_v43  ;;  %v3501_v50 = vpop.f32.mrb[14].mxu0 }
 0x1ff   : > { %v2297_v51 = vmax.f32 %v2265_v47, 0.0  ;;  %v3664_v53 = vadd.f32 %v3501_v50, %v941_v27  ;;  %v2076_v54 = vpop.f32.mrb[15].mxu0 }
 0x200   : > { %v2296_v55 = vmax.f32 %v2264_v49, 0.0  ;;  %v3666_v56 = vadd.f32 %v2076_v54, %v936_v29 }
 0x201   : > { %v2331_v57 = vmul.f32 %v4753_v48, %v2297_v51  ;;  %v2267_v58 = vadd.f32 %v3664_v53, %v4750_v43 }
 0x202   : > { %v2330_v59 = vmul.f32 %v4756_v52, %v2296_v55  ;;  %v2266_v60 = vadd.f32 %v3666_v56, %v4750_v43  ;;  %v3504_v62 = vpop.f32.mrb[16].mxu0 }
 0x203   : > { %v3392_v61 = vpop.f32.mrb[24].mxu1  ;;  %v2299_v63 = vmax.f32 %v2267_v58, 0.0  ;;  %v2086_v4 = vpop.f32.mrb[17].mxu0 }
 0x204   : > { %v3667_v0 = vadd.f32 %v3392_v61, %v4734_v2  ;;  %v1304_v1 = vpop.f32.mrb[25].mxu1  ;;  %v2362_v5 = vmax.f32 %v2330_v59, %v2331_v57  ;;  %v2298_v7 = vmax.f32 %v2266_v60, 0.0 }
 0x205   : > { %v3669_v14 = vadd.f32 %v1304_v1, %v4736_v3  ;;  %v2333_v15 = vmul.f32 %v4753_v48, %v2299_v63 }
 0x206   : > { %v3668_v16 = vadd.f32 %v3667_v0, %v3504_v62  ;;  %v2363_v13 = vrot.slane %v2362_v5, 4  ;;  %v2332_v17 = vmul.f32 %v4756_v52, %v2298_v7  ;;  %v3507_v21 = vpop.f32.mrb[18].mxu0 }
 0x207   : > { %v3670_v18 = vadd.f32 %v3669_v14, %v2086_v4  ;;  %v3395_v19 = vpop.f32.mrb[26].mxu1  ;;  %v2096_v24 = vpop.f32.mrb[19].mxu0 }
 0x208   : > { %v2269_v22 = vadd.f32 %v3668_v16, %v4750_v43  ;;  %v3671_v23 = vadd.f32 %v3395_v19, %v4738_v6  ;;  %v1314_v2 = vpop.f32.mrb[27].mxu1  ;;  %v2364_v20 = vmax.f32 %v2362_v5, %v2363_v13  ;;  %v2369_v25 = vmax.f32 %v2332_v17, %v2333_v15 }
 0x209   : > { %v2268_v26 = vadd.f32 %v3670_v18, %v4750_v43  ;;  %v3673_v3 = vadd.f32 %v1314_v2, %v4740_v8 }
 0x20a   : > { %v2301_v27 = vmax.f32 %v2269_v22, 0.0  ;;  %v3672_v28 = vadd.f32 %v3671_v23, %v3507_v21  ;;  %v2365_v29 = vrot.slane %v2364_v20, 2  ;;  %v2370_v30 = vrot.slane %v2369_v25, 4  ;;  %v3510_v34 = vpop.f32.mrb[20].mxu0 }
 0x20b   : > { %v2300_v31 = vmax.f32 %v2268_v26, 0.0  ;;  %v3674_v32 = vadd.f32 %v3673_v3, %v2096_v24  ;;  %v3398_v33 = vpop.f32.mrb[28].mxu1  ;;  %v2106_v38 = vpop.f32.mrb[21].mxu0 }
 0x20c   : > { %v2335_v35 = vmul.f32 %v4753_v48, %v2301_v27  ;;  %v2271_v6 = vadd.f32 %v3672_v28, %v4750_v43  ;;  %v3675_v36 = vadd.f32 %v3398_v33, %v4742_v9  ;;  %v1324_v37 = vpop.f32.mrb[29].mxu1  ;;  %v2366_v39 = vmax.f32 %v2364_v20, %v2365_v29 }
 0x20d   : > { %v2371_v40 = vmax.f32 %v2369_v25, %v2370_v30  ;;  %v2334_v8 = vmul.f32 %v4756_v52, %v2300_v31  ;;  %v2270_v41 = vadd.f32 %v3674_v32, %v4750_v43  ;;  %v3677_v45 = vadd.f32 %v1324_v37, %v4744_v10 }
 0x20e   : > { %v2303_v42 = vmax.f32 %v2271_v6, 0.0  ;;  %v3676_v44 = vadd.f32 %v3675_v36, %v3510_v34  ;;  %v2367_v46 = vrot.slane %v2366_v39, 1  ;;  %v3513_v53 = vpop.f32.mrb[22].mxu0 }
 0x20f   : > { %v2372_v47 = vrot.slane %v2371_v40, 2  ;;  %v2376_v49 = vmax.f32 %v2334_v8, %v2335_v35  ;;  %v2302_v50 = vmax.f32 %v2270_v41, 0.0  ;;  %v3401_v51 = vpop.f32.mrb[30].mxu1  ;;  %v3678_v55 = vadd.f32 %v3677_v45, %v2106_v38  ;;  %v2116_v58 = vpop.f32.mrb[23].mxu0 }
 0x210   : > { %v2337_v9 = vmul.f32 %v4753_v48, %v2303_v42  ;;  %v2273_v54 = vadd.f32 %v3676_v44, %v4750_v43  ;;  %v3679_v56 = vadd.f32 %v3401_v51, %v4746_v11  ;;  %v1334_v57 = vpop.f32.mrb[31].mxu1  ;;  %v2368_v1 = vmax.f32 %v2366_v39, %v2367_v46 }
 0x211   : > { %v2373_v59 = vmax.f32 %v2371_v40, %v2372_v47  ;;  %v2377_v60 = vrot.slane %v2376_v49, 4  ;;  %v2336_v61 = vmul.f32 %v4756_v52, %v2302_v50  ;;  %v2272_v62 = vadd.f32 %v3678_v55, %v4750_v43 }
 0x212   : > { %v2305_v10 = vmax.f32 %v2273_v54, 0.0  ;;  %v3680_v63 = vadd.f32 %v3679_v56, %v3513_v53  ;;  %v3681_v0 = vadd.f32 %v1334_v57, %v4748_v12  ;;  %v3516_v15 = vpop.f32.mrb[24].mxu0 }
 0x213   : > { %v2374_v4 = vrot.slane %v2373_v59, 1  ;;  %v2378_v5 = vmax.f32 %v2376_v49, %v2377_v60  ;;  %v2383_v7 = vmax.f32 %v2336_v61, %v2337_v9  ;;  %v3404_v14 = vpop.f32.mrb[0].mxu1  ;;  %v2304_v16 = vmax.f32 %v2272_v62, 0.0  ;;  %v2126_v19 = vpop.f32.mrb[25].mxu0 }
 0x214   : > { %v2339_v11 = vmul.f32 %v4753_v48, %v2305_v10  ;;  %v2275_v13 = vadd.f32 %v3680_v63, %v4750_v43  ;;  %v3682_v17 = vadd.f32 %v3681_v0, %v2116_v58  ;;  %v1344_v18 = vpop.f32.mrb[1].mxu1  ;;  %v3683_v2 = vadd.f32 %v3516_v15, %v3404_v14 }
 0x215   : > { %v2375_v21 = vmax.f32 %v2373_v59, %v2374_v4  ;;  %v2379_v22 = vrot.slane %v2378_v5, 2  ;;  %v2384_v23 = vrot.slane %v2383_v7, 4  ;;  %v2338_v12 = vmul.f32 %v4756_v52, %v2304_v16 }
 0x216   : > { %v2307_v24 = vmax.f32 %v2275_v13, 0.0  ;;  %v2274_v20 = vadd.f32 %v3682_v17, %v4750_v43  ;;  %v3684_v25 = vadd.f32 %v2126_v19, %v1344_v18  ;;  %v2277_v27 = vadd.f32 %v3683_v2, %v4750_v43  ;;  %v3519_v29 = vpop.f32.mrb[26].mxu0 }
 0x217   : > { %v2380_v26 = vmax.f32 %v2378_v5, %v2379_v22  ;;  %v2385_v3 = vmax.f32 %v2383_v7, %v2384_v23  ;;  %v3407_v28 = vpop.f32.mrb[2].mxu1  ;;  %v4788_v30 = vsel %vm2513_vm1, %v2375_v21, %v2368_v1  ;;  %v2390_v31 = vmax.f32 %v2338_v12, %v2339_v11  ;;  %v2136_v6 = vpop.f32.mrb[27].mxu0 }
 0x218   : > { %v2341_v32 = vmul.f32 %v4753_v48, %v2307_v24  ;;  %v2306_v33 = vmax.f32 %v2274_v20, 0.0  ;;  %v2276_v34 = vadd.f32 %v3684_v25, %v4750_v43  ;;  %v1354_v35 = vpop.f32.mrb[3].mxu1  ;;  %v2309_v38 = vmax.f32 %v2277_v27, 0.0 }
 0x219   : > { %v2381_v36 = vrot.slane %v2380_v26, 1  ;;  %v2386_v37 = vrot.slane %v2385_v3, 2  ;;  %v3685_v39 = vadd.f32 %v3519_v29, %v3407_v28  ;;  %v2391_v40 = vrot.slane %v2390_v31, 4 }
 0x21a   : > { %v2340_v8 = vmul.f32 %v4756_v52, %v2306_v33  ;;  %v2308_v41 = vmax.f32 %v2276_v34, 0.0  ;;  %v3686_v42 = vadd.f32 %v2136_v6, %v1354_v35  ;;  %v2343_v46 = vmul.f32 %v4753_v48, %v2309_v38  ;;  %v3522_v50 = vpop.f32.mrb[28].mxu0 }
 0x21b   : > { %v4793_v44 = vmax.f32 %v2380_v26, %v2381_v36  ;;  %v2387_v45 = vmax.f32 %v2385_v3, %v2386_v37  ;;  %v2279_v47 = vadd.f32 %v3685_v39, %v4750_v43  ;;  %v3410_v49 = vpop.f32.mrb[4].mxu1  ;;  %v2392_v51 = vmax.f32 %v2390_v31, %v2391_v40  ;;  %v2146_v56 = vpop.f32.mrb[29].mxu0 }
 0x21c   : > { %v2397_v53 = vmax.f32 %v2340_v8, %v2341_v32  ;;  %v2342_v9 = vmul.f32 %v4756_v52, %v2308_v41  ;;  %v2278_v54 = vadd.f32 %v3686_v42, %v4750_v43  ;;  %v1364_v55 = vpop.f32.mrb[5].mxu1  ;;  %v3687_v59 = vadd.f32 %v3522_v50, %v3410_v49 }
 0x21d   : > { %v2388_v57 = vrot.slane %v2387_v45, 1  ;;  %v2311_v58 = vmax.f32 %v2279_v47, 0.0  ;;  %v3688_v60 = vadd.f32 %v2146_v56, %v1364_v55  ;;  %v2393_v61 = vrot.slane %v2392_v51, 2 }
 0x21e   : > { %v2398_v10 = vrot.slane %v2397_v53, 4  ;;  %v2404_v62 = vmax.f32 %v2342_v9, %v2343_v46  ;;  %v2310_v63 = vmax.f32 %v2278_v54, 0.0  ;;  %v2281_v4 = vadd.f32 %v3687_v59, %v4750_v43  ;;  %v3525_v14 = vpop.f32.mrb[30].mxu0 }
 0x21f   : > { %v4799_v0 = vmax.f32 %v2387_v45, %v2388_v57  ;;  %v2345_v1 = vmul.f32 %v4753_v48, %v2311_v58  ;;  %v2280_v5 = vadd.f32 %v3688_v60, %v4750_v43  ;;  %v3413_v7 = vpop.f32.mrb[6].mxu1  ;;  %v2394_v15 = vmax.f32 %v2392_v51, %v2393_v61  ;;  %v2156_v18 = vpop.f32.mrb[31].mxu0 }
 0x220   : > { %v2399_v11 = vmax.f32 %v2397_v53, %v2398_v10  ;;  %v2405_v16 = vrot.slane %v2404_v62, 4  ;;  %v2344_v13 = vmul.f32 %v4756_v52, %v2310_v63  ;;  %v1374_v17 = vpop.f32.mrb[7].mxu1  ;;  %v2313_v19 = vmax.f32 %v2281_v4, 0.0 }
 0x221   : > { %v2312_v21 = vmax.f32 %v2280_v5, 0.0  ;;  %v3689_v22 = vadd.f32 %v3525_v14, %v3413_v7  ;;  %v3690_v23 = vadd.f32 %v2156_v18, %v1374_v17  ;;  %v2395_v2 = vrot.slane %v2394_v15, 1 }
 0x222   : > { %v2400_v12 = vrot.slane %v2399_v11, 2  ;;  %v2406_v24 = vmax.f32 %v2404_v62, %v2405_v16  ;;  %v2411_v20 = vmax.f32 %v2344_v13, %v2345_v1  ;;  %v2347_v25 = vmul.f32 %v4753_v48, %v2313_v19  ;;  %v3528_v29 = vpop.f32.mrb[32].mxu0 }
 0x223   : > { %v2346_v26 = vmul.f32 %v4756_v52, %v2312_v21  ;;  %v2283_v3 = vadd.f32 %v3689_v22, %v4750_v43  ;;  %v2282_v27 = vadd.f32 %v3690_v23, %v4750_v43  ;;  %v3416_v28 = vpop.f32.mrb[8].mxu1  ;;  %v2166_v6 = vpop.f32.mrb[33].mxu0  ;;  %v4810_v41 = vmax.f32 %v2394_v15, %v2395_v2 }
 0x224   : > { %v2401_v31 = vmax.f32 %v2399_v11, %v2400_v12  ;;  %v2407_v32 = vrot.slane %v2406_v24, 2  ;;  %v2412_v33 = vrot.slane %v2411_v20, 4  ;;  %v3691_v34 = vadd.f32 %v3528_v29, %v3416_v28  ;;  %v1384_v35 = vpop.f32.mrb[9].mxu1 }
 0x225   : > { %v2418_v36 = vmax.f32 %v2346_v26, %v2347_v25  ;;  %v2315_v37 = vmax.f32 %v2283_v3, 0.0  ;;  %v2314_v38 = vmax.f32 %v2282_v27, 0.0  ;;  %v3692_v39 = vadd.f32 %v2166_v6, %v1384_v35 }
 0x226   : > { %v2413_v40 = vmax.f32 %v2411_v20, %v2412_v33  ;;  %v2285_v8 = vadd.f32 %v3691_v34, %v4750_v43  ;;  %v2402_v42 = vrot.slane %v2401_v31, 1  ;;  %v3531_v51 = vpop.f32.mrb[34].mxu0  ;;  %v2408_v57 = vmax.f32 %v2406_v24, %v2407_v32 }
 0x227   : > { %v2419_v45 = vrot.slane %v2418_v36, 4  ;;  %v2349_v46 = vmul.f32 %v4753_v48, %v2315_v37  ;;  %v2348_v47 = vmul.f32 %v4756_v52, %v2314_v38  ;;  %v2284_v49 = vadd.f32 %v3692_v39, %v4750_v43  ;;  %v3419_v50 = vpop.f32.mrb[10].mxu1  ;;  %v2176_v55 = vpop.f32.mrb[35].mxu0 }
 0x228   : > { %v2317_v53 = vmax.f32 %v2285_v8, 0.0  ;;  %v3693_v9 = vadd.f32 %v3531_v51, %v3419_v50  ;;  %v1394_v54 = vpop.f32.mrb[11].mxu1  ;;  %v4815_v56 = vmax.f32 %v2401_v31, %v2402_v42  ;;  %v2409_v63 = vrot.slane %v2408_v57, 1 }
 0x229   : > { %v2420_v58 = vmax.f32 %v2418_v36, %v2419_v45  ;;  %v2425_v59 = vmax.f32 %v2348_v47, %v2349_v46  ;;  %v2316_v60 = vmax.f32 %v2284_v49, 0.0  ;;  %v3694_v61 = vadd.f32 %v2176_v55, %v1394_v54 }
 0x22a   : > { %v2351_v10 = vmul.f32 %v4753_v48, %v2317_v53  ;;  %v2287_v62 = vadd.f32 %v3693_v9, %v4750_v43  ;;  %v2414_v1 = vrot.slane %v2413_v40, 2  ;;  %v3534_v11 = vpop.f32.mrb[36].mxu0  ;;  %v2410_v19 = vmax.f32 %v2408_v57, %v2409_v63 }
 0x22b   : > { %v2421_v4 = vrot.slane %v2420_v58, 2  ;;  %v2426_v5 = vrot.slane %v2425_v59, 4  ;;  %v2350_v7 = vmul.f32 %v4756_v52, %v2316_v60  ;;  %v2286_v14 = vadd.f32 %v3694_v61, %v4750_v43  ;;  %v3422_v15 = vpop.f32.mrb[12].mxu1  ;;  %v2186_v18 = vpop.f32.mrb[37].mxu0 }
 0x22c   : > { %v2319_v16 = vmax.f32 %v2287_v62, 0.0  ;;  %v3695_v13 = vadd.f32 %v3534_v11, %v3422_v15  ;;  %v1404_v17 = vpop.f32.mrb[13].mxu1  ;;  %v2415_v21 = vmax.f32 %v2413_v40, %v2414_v1  ;;  %v2516_v53 = vsel %vm2515_vm2, %v4793_v44, %v4788_v30 }
 0x22d   : > { %v2422_v22 = vmax.f32 %v2420_v58, %v2421_v4  ;;  %v2427_v23 = vmax.f32 %v2425_v59, %v2426_v5  ;;  %v2432_v2 = vmax.f32 %v2350_v7, %v2351_v10  ;;  %v2318_v12 = vmax.f32 %v2286_v14, 0.0 }
 0x22e   : > { %v2353_v24 = vmul.f32 %v4753_v48, %v2319_v16  ;;  %v2289_v20 = vadd.f32 %v3695_v13, %v4750_v43  ;;  %v3696_v25 = vadd.f32 %v2186_v18, %v1404_v17  ;;  %v2416_v26 = vrot.slane %v2415_v21, 1  ;;  %v3537_v32 = vpop.f32.mrb[38].mxu0 }
 0x22f   : > { %v2423_v3 = vrot.slane %v2422_v22, 1  ;;  %v2428_v27 = vrot.slane %v2427_v23, 2  ;;  %v2433_v28 = vrot.slane %v2432_v2, 4  ;;  %v2352_v29 = vmul.f32 %v4756_v52, %v2318_v12  ;;  %v3425_v31 = vpop.f32.mrb[14].mxu1  ;;  %v2196_v36 = vpop.f32.mrb[39].mxu0 }
 0x230   : > { %v2321_v33 = vmax.f32 %v2289_v20, 0.0  ;;  %v2288_v34 = vadd.f32 %v3696_v25, %v4750_v43  ;;  %v3697_v35 = vadd.f32 %v3537_v32, %v3425_v31  ;;  %v1414_v6 = vpop.f32.mrb[15].mxu1  ;;  %v2417_v37 = vmax.f32 %v2415_v21, %v2416_v26 }
 0x231   : > { %v2424_v38 = vmax.f32 %v2422_v22, %v2423_v3  ;;  %v2429_v39 = vmax.f32 %v2427_v23, %v2428_v27  ;;  %v2434_v40 = vmax.f32 %v2432_v2, %v2433_v28  ;;  %v2439_v8 = vmax.f32 %v2352_v29, %v2353_v24 }
 0x232   : > { %v2355_v42 = vmul.f32 %v4753_v48, %v2321_v33  ;;  %v2320_v45 = vmax.f32 %v2288_v34, 0.0  ;;  %v2291_v46 = vadd.f32 %v3697_v35, %v4750_v43  ;;  %v3698_v47 = vadd.f32 %v2196_v36, %v1414_v6  ;;  %v3540_v54 = vpop.f32.mrb[40].mxu0 }
 0x233   : > { %v2430_v49 = vrot.slane %v2429_v39, 1  ;;  %v2435_v50 = vrot.slane %v2434_v40, 2  ;;  %v2440_v51 = vrot.slane %v2439_v8, 4  ;;  %v3428_v9 = vpop.f32.mrb[16].mxu1  ;;  %v2518_v59 = vsel %vm2517_vm3, %v4799_v0, %v2516_v53  ;;  %v2206_v61 = vpop.f32.mrb[41].mxu0 }
 0x234   : > { %v2354_v55 = vmul.f32 %v4756_v52, %v2320_v45  ;;  %v2323_v57 = vmax.f32 %v2291_v46, 0.0  ;;  %v2290_v58 = vadd.f32 %v3698_v47, %v4750_v43  ;;  %v1424_v60 = vpop.f32.mrb[17].mxu1  ;;  %v2520_v1 = vsel %vm2519_vm4, %v4810_v41, %v2518_v59 }
 0x235   : > { %v2431_v10 = vmax.f32 %v2429_v39, %v2430_v49  ;;  %v2436_v62 = vmax.f32 %v2434_v40, %v2435_v50  ;;  %v2441_v63 = vmax.f32 %v2439_v8, %v2440_v51  ;;  %v2522_v5 = vsel %vm2521_vm5, %v4815_v56, %v2520_v1 }
 0x236   : > { %v2446_v4 = vmax.f32 %v2354_v55, %v2355_v42  ;;  %v2357_v30 = vmul.f32 %v4753_v48, %v2323_v57  ;;  %v2322_v44 = vmax.f32 %v2290_v58, 0.0  ;;  %v2524_v0 = vsel %vm2523_vm6, %v2410_v19, %v2522_v5  ;;  %v3543_v16 = vpop.f32.mrb[42].mxu0  ;;  %v3057_v5 = vld [vmem:[#allocation11] ss:$0 sm:$0xff] }
 0x237   : > { %v2527_v7 = vsel %vm2513_vm1, %v2431_v10, %v2424_v38  ;;  %v2437_v14 = vrot.slane %v2436_v62, 1  ;;  %v2442_v15 = vrot.slane %v2441_v63, 2  ;;  %v3431_v11 = vpop.f32.mrb[18].mxu1  ;;  %v2526_v41 = vsel %vm2525_vm7, %v2417_v37, %v2524_v0  ;;  %v2216_v22 = vpop.f32.mrb[43].mxu0 }
 0x238   : > { %v2447_v13 = vrot.slane %v2446_v4, 4  ;;  %v2356_v17 = vmul.f32 %v4756_v52, %v2322_v44  ;;  %v3699_v18 = vadd.f32 %v3540_v54, %v3428_v9  ;;  %v1434_v21 = vpop.f32.mrb[19].mxu1  ;;  %3576 = vmatprep.mubr.f32.mxu1 %v2526_v41  ;;  %v3700_v56 = vadd.f32 %v2206_v61, %v1424_v60 }
 0x239   : > { %v2438_v23 = vmax.f32 %v2436_v62, %v2437_v14  ;;  %v2443_v2 = vmax.f32 %v2441_v63, %v2442_v15  ;;  %v3701_v12 = vadd.f32 %v3543_v16, %v3431_v11  ;;  %v3702_v19 = vadd.f32 %v2216_v22, %v1434_v21 }
 0x23a   : > { %v2448_v24 = vmax.f32 %v2446_v4, %v2447_v13  ;;  %v2453_v20 = vmax.f32 %v2356_v17, %v2357_v30  ;;  %v2293_v25 = vadd.f32 %v3699_v18, %v4750_v43  ;;  %v2292_v3 = vadd.f32 %v3700_v56, %v4750_v43 }
 0x23b   : > { %v2444_v26 = vrot.slane %v2443_v2, 1  ;;  %v2295_v27 = vadd.f32 %v3701_v12, %v4750_v43  ;;  %v2528_v28 = vsel %vm2515_vm2, %v2438_v23, %v2527_v7  ;;  %v2294_v33 = vadd.f32 %v3702_v19, %v4750_v43 }
 0x23c   : > { %v2449_v29 = vrot.slane %v2448_v24, 2  ;;  %v2454_v31 = vrot.slane %v2453_v20, 4  ;;  %v2325_v32 = vmax.f32 %v2293_v25, 0.0  ;;  %v2324_v35 = vmax.f32 %v2292_v3, 0.0 }
 0x23d   : > { %v2445_v34 = vmax.f32 %v2443_v2, %v2444_v26  ;;  %v2327_v6 = vmax.f32 %v2295_v27, 0.0  ;;  %v2326_v39 = vmax.f32 %v2294_v33, 0.0 }
 0x23e   : > { %v2450_v36 = vmax.f32 %v2448_v24, %v2449_v29  ;;  %v2455_v37 = vmax.f32 %v2453_v20, %v2454_v31  ;;  %v2359_v38 = vmul.f32 %v4753_v48, %v2325_v32  ;;  %v2358_v40 = vmul.f32 %v4756_v52, %v2324_v35 }
 0x23f   : > { %v2361_v8 = vmul.f32 %v4753_v48, %v2327_v6  ;;  %v2529_v42 = vsel %vm2517_vm3, %v2445_v34, %v2528_v28  ;;  %v2360_v47 = vmul.f32 %v4756_v52, %v2326_v39 }
 0x240   : > { %v2451_v45 = vrot.slane %v2450_v36, 1  ;;  %v2456_v46 = vrot.slane %v2455_v37, 2  ;;  %v2460_v49 = vmax.f32 %v2358_v40, %v2359_v38 }
 0x241   : > { %v2467_v51 = vmax.f32 %v2360_v47, %v2361_v8 }
 0x242   : > { %v2452_v43 = vmax.f32 %v2450_v36, %v2451_v45  ;;  %v2457_v50 = vmax.f32 %v2455_v37, %v2456_v46  ;;  %v2461_v53 = vrot.slane %v2460_v49, 4 }
 0x243   : > { %v2468_v54 = vrot.slane %v2467_v51, 4 }
 0x244   : > { %v2458_v9 = vrot.slane %v2457_v50, 1  ;;  %v2530_v55 = vsel %vm2519_vm4, %v2452_v43, %v2529_v42  ;;  %v2462_v57 = vmax.f32 %v2460_v49, %v2461_v53 }
 0x245   : > { %v2469_v59 = vmax.f32 %v2467_v51, %v2468_v54 }
 0x246   : > { %v2459_v58 = vmax.f32 %v2457_v50, %v2458_v9  ;;  %v2463_v48 = vrot.slane %v2462_v57, 2 }
 0x247   : > { %v2470_v60 = vrot.slane %v2469_v59, 2 }
 0x248   : > { %v2531_v61 = vsel %vm2521_vm5, %v2459_v58, %v2530_v55  ;;  %v2464_v10 = vmax.f32 %v2462_v57, %v2463_v48 }
 0x249   : > { %v2471_v52 = vmax.f32 %v2469_v59, %v2470_v60 }
 0x24a   : > { %v2465_v62 = vrot.slane %v2464_v10, 1 }
 0x24b   : > { %v2472_v63 = vrot.slane %v2471_v52, 1 }
 0x24c   : > { %v2466_v1 = vmax.f32 %v2464_v10, %v2465_v62 }
 0x24d   : > { %v2473_v4 = vmax.f32 %v2471_v52, %v2472_v63 }
 0x24e   : > { %v2532_v30 = vsel %vm2523_vm6, %v2466_v1, %v2531_v61 }
 0x24f   : > { %v2533_v44 = vsel %vm2525_vm7, %v2473_v4, %v2532_v30 }
 0x250   : > { %3577 = vmatmul.mubr.f32.vlgmr.msra.gmra.mrb[32].mxu1 %v2533_v44 }
 0x323   : > { %v3578_v7 = vpop.f32.mrb[32].mxu1 }
 0x324   : > { %v2608_v14 = vadd.f32 %v3578_v7, %v3057_v5  ;;  %v2602_v15 = vpop.f32.mrb[33].mxu1 }
 0x325   : > { %v2603_v0 = vadd.f32 %v3057_v5, %v2602_v15 }
 0x326   : > { %2612 = vst [vmem:[%s364_s8 + $0x8] sm:$0xff] %v2608_v14 }
 0x327   : > { %2611 = vst [vmem:[%s364_s8] sm:$0xff] %v2603_v0 }
 0x328   : > { %4051 = shalt.err (!%p4048_p6)
}
 0x329   : > { %s4052_s18 = scalar_lea.hbm %s4864_s12, 256  ;;  %s4056_s19 = scalar_lea.hbm %s4914_s6, 512 }
 0x32a   : > { %p4053_p11 = scmp.ne.s32.totalorder %s4864_s12, %s4052_s18  ;;  %p4057_p0 = scmp.lt.u32.totalorder %s4864_s12, %s4914_s6 }
 0x32b   : > { %p4058_p7 = scmp.lt.u32.totalorder %s4056_s19, %s4052_s18  ;;  %p4060_p10 = scmp.lt.u32.totalorder %s4052_s18, %s4864_s12 }
 0x32c   : > { %p4054_p12 = pnand %p4053_p11, %p4946_p9 }
 0x32d   : > { %p4059_p8 = por %p4058_p7, %p4057_p0 }
 0x32e   : > { %p4055_p13 = pneg %p4054_p12 }
 0x32f   : > { %p4061_p1 = por %p4060_p10, %p4059_p8 }
 0x331   : > { %p4062_p3 = pnand %p4061_p1, %p4055_p13 }
 0x333   : > { %4065 = shalt.err (!%p4062_p3)
}
 0x334   : > { %s4132_s10 = smov 128   ;;  %s4133_s21 = smov 8  }
 0x335   : > { %3818 = dma.vmem_to_hbm [thread:$0]  (%p4946_p9), %s4859_s11, 256, %s4864_s12, %s2614_s15, %s4132_s10, %s4132_s10, %s4133_s21  }
 0x336 PF: > { %s4947_s7 = sld [smem:[#allocation22_spill]]  ;;  %s4948_s8 = sld [smem:[#allocation25_spill]] }
 0x33c   : > { %s2642_s28 = sand.u32 1, %s4947_s7   ;;  %p4949_p2 = scmp.ne.s32.totalorder %s4948_s8, 0 }
 0x33d   : > { %s2643_s20 = scalar_lea.sflag [#allocation4], %s2642_s28 }
 0x33e   : > { %p3837_p5 = pnand %p2755_p4, %p4949_p2 }
 0x340   : > { %4099 = dma.done.wait (!%p3837_p5), %s2643_s20, 256  }
 0x341   : > { %4101 = vsyncadd (!%p3837_p5), %s2643_s20, 4294967040  ;;  %s4950_s24 = sld [smem:[#allocation23_spill]]  ;;  %s4951_s29 = sld [smem:[#allocation24_spill]] }
 0x342   : > { %s4952_s21 = smov %s4108_s22  ;;  %s4953_s22 = smov %s4112_s23 }
 0x347   : > { %p22_p6 = scmp.ge.s32.totalorder %s4950_s24, 4   ;;  %s4954_s23 = smov %s4951_s29 }
 0x349   :  { %24 = sbr.rel (!%p22_p6) target bundleno = 10 (0xa), region = 122 }
 0x350   :  { %2648 = vsyncpa [#allocation3], 1 }
 0x351   :  { %2650 = vsyncpa [#allocation3 + $0x1], 1 }
 0x352   :  { %2651 = vsyncpa [#allocation6], 1 }
 0x353   :  { %2652 = vsyncpa [#allocation9], 1 }
 0x354   :  { %2653 = vsyncpa [#allocation12], 1 }
 0x355   :  { %2654 = vsyncpa [#allocation4], 1 }
 0x356   :  { %2656 = vsyncpa [#allocation4 + $0x1], 1 }

</bundles_post_ra>
